<compile_context>
chip_gen: v7x
topology: tpu7x:2x2x1
jax: 0.10.0
libtpu: 0.0.40
codegen_flags: <defaults>
</compile_context>

<pallas_src>
import functools
import math

import jax
import jax.numpy as jnp
from jax import lax
from jax.experimental import pallas as pl
from jax.experimental.pallas import tpu as pltpu


def _vmem_capacity_bytes():
    try:
        return int(pltpu.get_tpu_info().vmem_capacity_bytes)
    except Exception:
        return 64 * 1024 * 1024          # conservative (v7x-sized) fallback


# ---------------------------------------------------------------------------
# Kernel 1: hoisted input-to-hidden projection (gridded / pipelined over rows)
#   x2d (Sp1*Bp, E) bf16 @ W_ih_cat (E, 8H) bf16 + b (1, 8H) f32
#   -> gf (Sp1*Bp, 4H) bf16 (forward pre-gates, PyTorch order i,f,g,o)
#      gb (Sp1*Bp, 4H) bf16 (backward pre-gates)
# ---------------------------------------------------------------------------
def input_proj_kernel(x_ref, w_ref, b_ref, gf_ref, gb_ref):
    g = jnp.dot(x_ref[...], w_ref[...], preferred_element_type=jnp.float32)
    g = g + b_ref[...]
    g4 = gf_ref.shape[-1]
    gf_ref[...] = g[:, :g4].astype(gf_ref.dtype)
    gb_ref[...] = g[:, g4:].astype(gb_ref.dtype)


# ---------------------------------------------------------------------------
# Kernel 2: streamed LSTM recurrence + chunked Conv1d(k=3)/pooling + Linear
# ---------------------------------------------------------------------------
def bilstm_main_kernel(gf_hbm, gb_hbm,               # (Sp1, Bp, 4H) bf16 in HBM
                       whh_f_ref, whh_b_ref,         # (H, 4H) bf16
                       conv_w_ref, conv_b_ref,       # (KW, 2H, Cop) bf16, (1, Cop) f32
                       fc_w_ref, fc_b_ref,           # (2*Cop, Cpad), (1, Cpad) f32
                       out_ref,                      # (Bb, Cpad) f32
                       gf_buf, gb_buf, sem, h_ref,   # scratch
                       *, S, Sc, TC, n_chunks, Sh):
    H = whh_f_ref.shape[0]
    Bb = out_ref.shape[0]
    KW = conv_w_ref.shape[0]
    Cop = conv_w_ref.shape[-1]

    j = pl.program_id(0)
    boff = pl.multiple_of(j * Bb, Bb)

    # ---- per-timestep double-buffered streaming of the pre-gates (P4) ----
    def start_fetch(t, slot):
        pltpu.make_async_copy(gf_hbm.at[t, pl.ds(boff, Bb)],
                              gf_buf.at[slot], sem.at[0, slot]).start()
        pltpu.make_async_copy(gb_hbm.at[S - 1 - t, pl.ds(boff, Bb)],
                              gb_buf.at[slot], sem.at[1, slot]).start()

    def wait_fetch(slot):
        pltpu.make_async_copy(gf_hbm.at[0, pl.ds(boff, Bb)],
                              gf_buf.at[slot], sem.at[0, slot]).wait()
        pltpu.make_async_copy(gb_hbm.at[0, pl.ds(boff, Bb)],
                              gb_buf.at[slot], sem.at[1, slot]).wait()

    start_fetch(0, 0)

    # ---- bidirectional LSTM recurrence (PyTorch gate order: i, f, g, o) ----
    def cell(g_pre, h_bf16, c_f32, whh_ref):
        gates = g_pre + jnp.dot(h_bf16, whh_ref[...],
                                preferred_element_type=jnp.float32)
        i = jax.nn.sigmoid(gates[:, 0 * H:1 * H])
        f = jax.nn.sigmoid(gates[:, 1 * H:2 * H])
        g = jnp.tanh(gates[:, 2 * H:3 * H])
        o = jax.nn.sigmoid(gates[:, 3 * H:4 * H])
        c_new = f * c_f32 + i * g
        h_new = (o * jnp.tanh(c_new)).astype(jnp.bfloat16)   # carried/stored as bf16
        return h_new, c_new

    def step(t, carry):
        h_f, c_f, h_b, c_b = carry
        slot = t & 1
        wait_fetch(slot)

        @pl.when(t + 1 < S)
        def _():
            start_fetch(t + 1, 1 - slot)          # prefetch next step while computing

        gpre_f = gf_buf[slot].astype(jnp.float32)
        gpre_b = gb_buf[slot].astype(jnp.float32)
        h_f, c_f = cell(gpre_f, h_f, c_f, whh_f_ref)
        h_b, c_b = cell(gpre_b, h_b, c_b, whh_b_ref)
        rf = pl.multiple_of(t * Bb, Bb)            # forward consumes time t
        rb = pl.multiple_of((S - 1 - t) * Bb, Bb)  # backward consumes S-1-t
        h_ref[pl.ds(rf, Bb), pl.ds(0, H)] = h_f    # merged scratch: fwd lanes [0:H]
        h_ref[pl.ds(rb, Bb), pl.ds(H, H)] = h_b    #                 bwd lanes [H:2H]
        return h_f, c_f, h_b, c_b

    hz = jnp.zeros((Bb, H), jnp.bfloat16)
    cz = jnp.zeros((Bb, H), jnp.float32)
    lax.fori_loop(0, S, step, (hz, cz, hz, cz))

    # zero the (small) time-padding tail so chunked conv reads are well-defined
    if Sh > S:
        h_ref[pl.ds(S * Bb, (Sh - S) * Bb), :] = jnp.zeros(
            ((Sh - S) * Bb, 2 * H), h_ref.dtype)

    # ---- Conv1d(2H -> Cop, kernel=KW, valid) + mean/max pool, time-chunked ----
    exact = (n_chunks * TC == Sc)

    def conv_chunk(ci, carry):
        s_acc, m_acc = carry
        acc = jnp.zeros((TC * Bb, Cop), jnp.float32)
        for k in range(KW):                        # KW matmuls with K = 2H = 256
            row0 = pl.multiple_of(ci * (TC * Bb) + k * Bb, Bb)
            acc = acc + jnp.dot(h_ref[pl.ds(row0, TC * Bb), :], conv_w_ref[k],
                                preferred_element_type=jnp.float32)
        acc = acc + conv_b_ref[...]
        acc3 = acc.reshape(TC, Bb, Cop)
        if exact:
            s_acc = s_acc + jnp.sum(acc3, axis=0)
            m_acc = jnp.maximum(m_acc, jnp.max(acc3, axis=0))
        else:                                      # mask the ragged final chunk
            t_loc = lax.broadcasted_iota(jnp.int32, (TC, 1, 1), 0)
            valid = (ci * TC + t_loc) < Sc
            s_acc = s_acc + jnp.sum(jnp.where(valid, acc3, 0.0), axis=0)
            m_acc = jnp.maximum(
                m_acc, jnp.max(jnp.where(valid, acc3, -jnp.inf), axis=0))
        return s_acc, m_acc

    s0 = jnp.zeros((Bb, Cop), jnp.float32)
    m0 = jnp.full((Bb, Cop), -jnp.inf, jnp.float32)
    s_acc, m_acc = lax.fori_loop(0, n_chunks, conv_chunk, (s0, m0))

    avg_p = s_acc * (1.0 / Sc)                     # mean over valid conv steps
    max_p = m_acc

    # ---- Linear on concat([avg, max]) — weight split instead of lane concat ----
    fcw = fc_w_ref[...]
    logits = (jnp.dot(avg_p, fcw[:Cop, :], preferred_element_type=jnp.float32)
              + jnp.dot(max_p, fcw[Cop:, :], preferred_element_type=jnp.float32)
              + fc_b_ref[...])
    out_ref[...] = logits.astype(out_ref.dtype)


# ---------------------------------------------------------------------------
# Wrapper
# ---------------------------------------------------------------------------
def bilstm_conv_forward(tokens, params):
    """tokens: (B, S) int32.  Returns logits (B, num_classes)."""
    B, S = tokens.shape
    E = params["emb_table"].shape[1]
    H = params["whh_f"].shape[0]
    KW = params["conv_w"].shape[0]
    Co = params["conv_w"].shape[-1]
    C = params["fc_w"].shape[-1]
    if S < KW:
        raise ValueError(f"sequence length {S} must be >= conv kernel size {KW}")

    Bp = ((B + 15) // 16) * 16            # batch padded to bf16 sublane tile
    Cop = ((Co + 127) // 128) * 128       # conv channels padded to lane width
    Cpad = ((C + 127) // 128) * 128       # logits padded to lane width

    # Generation-aware sizing (v5e/v6e: 128 MiB VMEM, v7x: 64 MiB + 2 TCs).
    vmem_cap = _vmem_capacity_bytes()
    big_vmem = vmem_cap >= 96 * 1024 * 1024
    vmem_limit1 = (100 << 20) if big_vmem else (48 << 20)
    target_rows = 8192 if big_vmem else 4096

    # kernel-1 tiling: pad the time axis so tiles never degenerate for awkward S
    s_chunk = max(1, min(S, target_rows // Bp))
    Sp1 = -(-S // s_chunk) * s_chunk
    tR = s_chunk * Bp
    rows1 = Sp1 * Bp

    # kernel-2 batch block: multiple of 16 dividing Bp, sized so the resident merged
    # hidden-state scratch fits; prefer >=2 blocks on 2-TC (v7x-like) chips.
    h_row_bytes = 2 * H * 2
    scratch_budget = max(8 << 20, vmem_cap // 2 - (8 << 20))
    cands = [d for d in range(16, Bp + 1, 16) if Bp % d == 0]
    Bb = cands[0]
    for d in cands:
        if (S + KW) * d * h_row_bytes <= scratch_budget:
            Bb = d
    if (not big_vmem) and Bb == Bp and Bp >= 32 and (Bp // 2) % 16 == 0:
        Bb = Bp // 2                       # megacore split on v7x
    nB = Bp // Bb

    # conv/pool time chunking (caps the live f32 conv accumulator)
    Sc = S - (KW - 1)
    TC = max(1, min(Sc, 2048 // Bb))
    n_chunks = -(-Sc // TC)
    Sh = n_chunks * TC + (KW - 1)

    h_bytes = Sh * Bb * h_row_bytes
    vmem_limit2 = min(max(16 << 20, vmem_cap - (8 << 20)),
                      max(vmem_limit1, h_bytes + (12 << 20)))
    # TODO(synk): for extreme S*B where even the (Sh*Bb, 2H) bf16 hidden scratch
    # exceeds VMEM, the hidden states would also need streaming / conv fusion.

    # Embedding gathered time-major directly in bf16; Dropout2d(p=0.2) is identity
    # at eval.  TODO(synk): training-mode channel dropout (Dropout2d) not implemented.
    emb_bf16 = params["emb_table"].astype(jnp.bfloat16)
    x = emb_bf16[tokens.T]                                    # (S, B, E)
    x = jnp.pad(x, ((0, Sp1 - S), (0, Bp - B), (0, 0)))
    x2d = x.reshape(rows1, E)

    # Weight prep (bf16 matmul operands, zero-padding).
    wih_cat = jnp.concatenate([params["wih_f"], params["wih_b"]],
                              axis=1).astype(jnp.bfloat16)
    b_cat = jnp.concatenate([params["b_f"], params["b_b"]], axis=1).astype(jnp.float32)
    whh_f = params["whh_f"].astype(jnp.bfloat16)
    whh_b = params["whh_b"].astype(jnp.bfloat16)

    conv_w = jnp.pad(params["conv_w"],
                     ((0, 0), (0, 0), (0, Cop - Co))).astype(jnp.bfloat16)
    conv_b = jnp.pad(params["conv_b"], ((0, 0), (0, Cop - Co))).astype(jnp.float32)

    fc_w = params["fc_w"]                                     # (2*Co, C)
    fc_w_pad = jnp.zeros((2 * Cop, Cpad), jnp.float32)
    fc_w_pad = fc_w_pad.at[:Co, :C].set(fc_w[:Co])            # avg-pool rows
    fc_w_pad = fc_w_pad.at[Cop:Cop + Co, :C].set(fc_w[Co:])   # max-pool rows
    fc_b_pad = jnp.zeros((1, Cpad), jnp.float32).at[:, :C].set(params["fc_b"])

    # ---- kernel 1: hoisted input projection, pipelined over big row chunks ----
    gf2d, gb2d = pl.pallas_call(
        input_proj_kernel,
        out_shape=(jax.ShapeDtypeStruct((rows1, 4 * H), jnp.bfloat16),
                   jax.ShapeDtypeStruct((rows1, 4 * H), jnp.bfloat16)),
        grid=(rows1 // tR,),
        in_specs=[pl.BlockSpec((tR, E), lambda i: (i, 0)),
                  pl.BlockSpec((E, 8 * H), lambda i: (0, 0)),
                  pl.BlockSpec((1, 8 * H), lambda i: (0, 0))],
        out_specs=[pl.BlockSpec((tR, 4 * H), lambda i: (i, 0)),
                   pl.BlockSpec((tR, 4 * H), lambda i: (i, 0))],
        compiler_params=pltpu.CompilerParams(
            dimension_semantics=("parallel",),
            vmem_limit_bytes=vmem_limit1),
    )(x2d, wih_cat, b_cat)

    gf = gf2d.reshape(Sp1, Bp, 4 * H)     # row-major split of leading dim: free
    gb = gb2d.reshape(Sp1, Bp, 4 * H)

    # ---- kernel 2: streamed recurrence + chunked conv/pool + fc ----
    main = functools.partial(bilstm_main_kernel, S=S, Sc=Sc, TC=TC,
                             n_chunks=n_chunks, Sh=Sh)
    out = pl.pallas_call(
        main,
        out_shape=jax.ShapeDtypeStruct((Bp, Cpad), jnp.float32),
        grid=(nB,),
        in_specs=[
            pl.BlockSpec(memory_space=pl.ANY),                   # gf (HBM, streamed)
            pl.BlockSpec(memory_space=pl.ANY),                   # gb (HBM, streamed)
            pl.BlockSpec((H, 4 * H), lambda j: (0, 0)),          # whh_f
            pl.BlockSpec((H, 4 * H), lambda j: (0, 0)),          # whh_b
            pl.BlockSpec((KW, 2 * H, Cop), lambda j: (0, 0, 0)), # conv_w (merged)
            pl.BlockSpec((1, Cop), lambda j: (0, 0)),            # conv_b
            pl.BlockSpec((2 * Cop, Cpad), lambda j: (0, 0)),     # fc_w
            pl.BlockSpec((1, Cpad), lambda j: (0, 0)),           # fc_b
        ],
        out_specs=pl.BlockSpec((Bb, Cpad), lambda j: (j, 0)),
        scratch_shapes=[
            pltpu.VMEM((2, Bb, 4 * H), jnp.bfloat16),   # gf double buffer
            pltpu.VMEM((2, Bb, 4 * H), jnp.bfloat16),   # gb double buffer
            pltpu.SemaphoreType.DMA((2, 2)),            # [direction, slot]
            pltpu.VMEM((Sh * Bb, 2 * H), jnp.bfloat16), # merged fwd|bwd hidden states
        ],
        compiler_params=pltpu.CompilerParams(
            dimension_semantics=("parallel",),
            vmem_limit_bytes=vmem_limit2),
    )(gf, gb, whh_f, whh_b, conv_w, conv_b, fc_w_pad, fc_b_pad)

    return out[:B, :C]


def init_params(key, num_tokens, num_classes, *, E=300, H=128, Co=64, KW=3):
    """Deterministic synthetic init matching the PyTorch module's shapes.

    All matmul weights stored pre-transposed for `x @ W`:
      torch weight_ih (4H, E)   -> (E, 4H)
      torch weight_hh (4H, H)   -> (H, 4H)
      torch conv1 w   (Co,2H,K) -> (K, 2H, Co)
      torch fc w      (C, 2Co)  -> (2Co, C)
    """
    ks = jax.random.split(key, 12)
    u = lambda k, shape, s: jax.random.uniform(k, shape, jnp.float32, -s, s)

    s_lstm = 1.0 / math.sqrt(H)                              # torch LSTM default init
    s_conv = 1.0 / math.sqrt(2 * H * KW)                     # torch Conv1d default init
    s_fc = math.sqrt(6.0 / (2 * Co + num_classes))           # xavier_uniform

    params = dict(
        emb_table=jax.random.normal(ks[0], (num_tokens, E), jnp.float32),
        wih_f=u(ks[1], (E, 4 * H), s_lstm),
        whh_f=u(ks[2], (H, 4 * H), s_lstm),
        b_f=u(ks[3], (1, 4 * H), s_lstm) + u(ks[4], (1, 4 * H), s_lstm),  # b_ih + b_hh
        wih_b=u(ks[5], (E, 4 * H), s_lstm),
        whh_b=u(ks[6], (H, 4 * H), s_lstm),
        b_b=u(ks[7], (1, 4 * H), s_lstm) + u(ks[8], (1, 4 * H), s_lstm),
        conv_w=u(ks[9], (KW, 2 * H, Co), s_conv),
        conv_b=u(ks[10], (1, Co), s_conv),
        fc_w=u(ks[11], (2 * Co, num_classes), s_fc),
        fc_b=jnp.zeros((1, num_classes), jnp.float32),        # init.constant(bias, 0)
    )
    return params


if __name__ == "__main__":
    key = jax.random.PRNGKey(0)
    k_tok, k_par = jax.random.split(key)

    B, S = 2, 8
    num_tokens, num_classes = 50, 4
    tokens = jax.random.randint(k_tok, (B, S), 0, num_tokens, dtype=jnp.int32)
    params = init_params(k_par, num_tokens, num_classes)

    logits = bilstm_conv_forward(tokens, params)
    logits = jax.block_until_ready(logits)
    assert logits.shape == (B, num_classes), logits.shape
    assert bool(jnp.all(jnp.isfinite(logits)))
    print("KERNEL_OK")
</pallas_src>

<mosaic_0001>
module attributes {stable_mosaic.version = 11 : i64} {
  func.func @input_proj_kernel(%arg0: i32, %arg1: memref<128x300xbf16, #tpu.memory_space<vmem>>, %arg2: memref<300x1024xbf16, #tpu.memory_space<vmem>>, %arg3: memref<1x1024xf32, #tpu.memory_space<vmem>>, %arg4: memref<128x512xbf16, #tpu.memory_space<vmem>>, %arg5: memref<128x512xbf16, #tpu.memory_space<vmem>>) attributes {dimension_semantics = [#tpu.dimension_semantics<parallel>], iteration_bounds = array<i64: 1>, scalar_prefetch = 0 : i64, scratch_operands = 0 : i64, tpu.core_type = #tpu.core_type<tc>, window_params = [{transform_indices = @transform_0, window_bounds = array<i64: 128, 300>}, {pipeline_mode = #tpu.pipeline_mode<synchronous>, transform_indices = @transform_1, window_bounds = array<i64: 300, 1024>}, {pipeline_mode = #tpu.pipeline_mode<synchronous>, transform_indices = @transform_2, window_bounds = array<i64: 1, 1024>}, {transform_indices = @transform_3, window_bounds = array<i64: 128, 512>}, {transform_indices = @transform_4, window_bounds = array<i64: 128, 512>}]} {
    %c0 = arith.constant 0 : index
    %c0_0 = arith.constant 0 : index
    %0 = vector.load %arg1[%c0, %c0_0] : memref<128x300xbf16, #tpu.memory_space<vmem>>, vector<128x300xbf16>
    %c0_1 = arith.constant 0 : index
    %c0_2 = arith.constant 0 : index
    %1 = vector.load %arg2[%c0_1, %c0_2] : memref<300x1024xbf16, #tpu.memory_space<vmem>>, vector<300x1024xbf16>
    %cst = arith.constant dense<0.000000e+00> : vector<128x1024xf32>
    %2 = tpu.matmul %0, %1, %cst {dimension_numbers = #tpu.dot_dimension_numbers<[1], [0], [0], [1], [0, 0, 1, 1], [], []>} : vector<128x300xbf16>, vector<300x1024xbf16>, vector<128x1024xf32> -> vector<128x1024xf32>
    %c0_3 = arith.constant 0 : index
    %c0_4 = arith.constant 0 : index
    %3 = vector.load %arg3[%c0_3, %c0_4] : memref<1x1024xf32, #tpu.memory_space<vmem>>, vector<1x1024xf32>
    %4 = vector.broadcast %3 : vector<1x1024xf32> to vector<128x1024xf32>
    %5 = arith.addf %2, %4 : vector<128x1024xf32>
    %6 = vector.extract_strided_slice %5 {offsets = [0, 0], sizes = [128, 512], strides = [1, 1]} : vector<128x1024xf32> to vector<128x512xf32>
    %7 = arith.truncf %6 : vector<128x512xf32> to vector<128x512xbf16>
    %c0_5 = arith.constant 0 : index
    %c0_6 = arith.constant 0 : index
    %8 = vector.load %arg4[%c0_5, %c0_6] : memref<128x512xbf16, #tpu.memory_space<vmem>>, vector<128x512xbf16>
    tpu.vector_store %arg4[%c0_5, %c0_6], %7 {strides = array<i32>} : memref<128x512xbf16, #tpu.memory_space<vmem>>, vector<128x512xbf16>,
    %9 = vector.extract_strided_slice %5 {offsets = [0, 512], sizes = [128, 512], strides = [1, 1]} : vector<128x1024xf32> to vector<128x512xf32>
    %10 = arith.truncf %9 : vector<128x512xf32> to vector<128x512xbf16>
    %c0_7 = arith.constant 0 : index
    %c0_8 = arith.constant 0 : index
    %11 = vector.load %arg5[%c0_7, %c0_8] : memref<128x512xbf16, #tpu.memory_space<vmem>>, vector<128x512xbf16>
    tpu.vector_store %arg5[%c0_7, %c0_8], %10 {strides = array<i32>} : memref<128x512xbf16, #tpu.memory_space<vmem>>, vector<128x512xbf16>,
    return
  }
  func.func @transform_0(%arg0: i32) -> (i32, i32) {
    %c0_i32 = arith.constant 0 : i32
    %c0_i32_0 = arith.constant 0 : i32
    return %arg0, %c0_i32 : i32, i32
  }
  func.func @transform_1(%arg0: i32) -> (i32, i32) {
    %c0_i32 = arith.constant 0 : i32
    %c0_i32_0 = arith.constant 0 : i32
    %c0_i32_1 = arith.constant 0 : i32
    return %c0_i32, %c0_i32_0 : i32, i32
  }
  func.func @transform_2(%arg0: i32) -> (i32, i32) {
    %c0_i32 = arith.constant 0 : i32
    %c0_i32_0 = arith.constant 0 : i32
    %c0_i32_1 = arith.constant 0 : i32
    return %c0_i32, %c0_i32_0 : i32, i32
  }
  func.func @transform_3(%arg0: i32) -> (i32, i32) {
    %c0_i32 = arith.constant 0 : i32
    %c0_i32_0 = arith.constant 0 : i32
    return %arg0, %c0_i32 : i32, i32
  }
  func.func @transform_4(%arg0: i32) -> (i32, i32) {
    %c0_i32 = arith.constant 0 : i32
    %c0_i32_0 = arith.constant 0 : i32
    return %arg0, %c0_i32 : i32, i32
  }
}

</mosaic_0001>

<bundles_post_ra>
// kernel: tpu_custom_call.1
= control target key start
LH: loop header
LB: loop body
LE: loop exit
PB: predicated region body
PF: predicated region fallthrough
CT: control target
= control target key end

     0   :  { %10 = vsyncpa [#allocation3], 0  ;;  %s3820_s0 = inlined_call_operand.vmem [shape: bf16[128,300], index: 0, kind: input, shape index: {}]   ;;  %s3821_s1 = inlined_call_operand.hbm [shape: bf16[300,1024], index: 1, kind: input, shape index: {}]   ;;  %s3822_s2 = inlined_call_operand.vmem [shape: f32[1,1024], index: 2, kind: input, shape index: {}]   ;;  %s3823_s3 = inlined_call_operand.hbm [shape: bf16[128,512], index: 3, kind: output, shape index: {0}]   ;;  %s3824_s4 = inlined_call_operand.hbm [shape: bf16[128,512], index: 4, kind: output, shape index: {1}]  }
   0x1   :  { %11 = vsyncpa [#allocation4], 0 }
   0x2   :  { %12 = vsyncpa [#allocation7], 0  ;;  %s3274_s15 = smov [#allocation2]   ;;  %s3202_s19 = scalar_lea.hbm %s3821_s1, 19456 }
   0x3   :  { %s20_s16 = sshll.u32 %s3274_s15, 4  ;;  %p3203_p0 = scmp.ne.s32.totalorder %s3821_s1, %s3202_s19  ;;  %s21_s16 = int_to_ptr.vmem [resolvable:$true] %s20_s16 }
   0x4   :  { %p3206_p1 = scmp.lt.u32.totalorder %s3202_s19, %s3821_s1 }
   0x6   :  { %p3208_p2 = pnand %p3206_p1, %p3203_p0 }
   0x8   :  { %3211 = shalt.err (!%p3208_p2)
}
   0x9   :  { %s3212_s24 = scalar_lea.vmem %s21_s16, 19456  ;;  %p3217_p4 = scmp.lt.s32.totalorder %s21_s16, %s21_s16 }
   0xa   :  { %p3213_p3 = scmp.ne.s32.totalorder %s21_s16, %s3212_s24  ;;  %p3218_p5 = scmp.lt.s32.totalorder %s3212_s24, %s3212_s24 }
   0xc   :  { %p3219_p6 = por %p3218_p5, %p3217_p4 }
   0xe   :  { %p3220_p7 = pnand %p3219_p6, %p3213_p3 }
  0x10   :  { %3223 = shalt.err (!%p3220_p7)
}
  0x11   :  { %s3275_s25 = smov 512   ;;  %s3276_s26 = smov 32  }
  0x12   :  { %26 = dma.hbm_to_vmem [thread:$0]  %s3821_s1, 19456, %s21_s16, [#allocation3], %s3275_s25, %s3275_s25, %s3276_s26  }
  0x13   :  { %3268 = dma.done.wait [#allocation3], 19456  }
  0x14   :  { %3269 = vsyncadd [#allocation3], 4294947840  ;;  %v65_v0 = vld [vmem:[#allocation2] sm:$0xff]  ;;  %v66_v2 = vld [vmem:[#allocation2 + $0x8] sm:$0xff]  ;;  %vm1156_vm0 = vcmask 1045504   ;;  %vm1131_vm1 = vcmask 359424  }
  0x15   :  { %v69_v1 = vld [vmem:[#allocation2 + $0x20] sm:$0xff]  ;;  %v70_v4 = vld [vmem:[#allocation2 + $0x28] sm:$0xff] }
  0x16   :  { %v2591_v3 = vcombine.high %v65_v0, %v69_v1  ;;  %v2590_v5 = vcombine.low %v65_v0, %v69_v1  ;;  %v73_v6 = vld [vmem:[#allocation2 + $0x40] sm:$0xff]  ;;  %v2593_v8 = vcombine.high %v66_v2, %v70_v4  ;;  %v2592_v9 = vcombine.low %v66_v2, %v70_v4  ;;  %v74_v11 = vld [vmem:[#allocation2 + $0x48] sm:$0xff] }
  0x17   :  { %v77_v7 = vld [vmem:[#allocation2 + $0x60] sm:$0xff]  ;;  %v78_v12 = vld [vmem:[#allocation2 + $0x68] sm:$0xff] }
  0x18   :  { %v2599_v10 = vcombine.high %v73_v6, %v77_v7  ;;  %v81_v13 = vld [vmem:[#allocation2 + $0x80] sm:$0xff]  ;;  %1181 = vmatprep.subr.bf16.mxu0 %v2591_v3  ;;  %v2601_v14 = vcombine.high %v74_v11, %v78_v12  ;;  %v82_v16 = vld [vmem:[#allocation2 + $0x88] sm:$0xff]  ;;  %1407 = vmatprep.subr.bf16.mxu1 %v2593_v8  ;;  %v2598_v18 = vcombine.low %v73_v6, %v77_v7 }
  0x19   :  { %v85_v15 = vld [vmem:[#allocation2 + $0xa0] sm:$0xff]  ;;  %v86_v17 = vld [vmem:[#allocation2 + $0xa8] sm:$0xff]  ;;  %1182 = vmatpush1.bf16.msra.mxu0 %v2590_v5  ;;  %1408 = vmatpush1.bf16.msra.mxu1 %v2592_v9  ;;  %v2600_v19 = vcombine.low %v74_v11, %v78_v12 }
  0x1a   :  { %1183 = vmatprep.subr.bf16.mxu0 %v2599_v10  ;;  %v2607_v20 = vcombine.high %v81_v13, %v85_v15  ;;  %1409 = vmatprep.subr.bf16.mxu1 %v2601_v14  ;;  %v2609_v21 = vcombine.high %v82_v16, %v86_v17  ;;  %v89_v22 = vld [vmem:[#allocation2 + $0xc0] sm:$0xff]  ;;  %v90_v24 = vld [vmem:[#allocation2 + $0xc8] sm:$0xff]  ;;  %v2606_v26 = vcombine.low %v81_v13, %v85_v15 }
  0x1b   :  { %v93_v23 = vld [vmem:[#allocation2 + $0xe0] sm:$0xff]  ;;  %v94_v25 = vld [vmem:[#allocation2 + $0xe8] sm:$0xff]  ;;  %v2608_v27 = vcombine.low %v82_v16, %v86_v17 }
  0x1c   :  { %v2615_v28 = vcombine.high %v89_v22, %v93_v23  ;;  %v2617_v29 = vcombine.high %v90_v24, %v94_v25  ;;  %v97_v30 = vld [vmem:[#allocation2 + $0x100] sm:$0xff]  ;;  %v98_v32 = vld [vmem:[#allocation2 + $0x108] sm:$0xff]  ;;  %v2614_v34 = vcombine.low %v89_v22, %v93_v23  ;;  %v2616_v35 = vcombine.low %v90_v24, %v94_v25 }
  0x1d   :  { %1184 = vmatpush1.bf16.msra.mxu0 %v2598_v18  ;;  %1410 = vmatpush1.bf16.msra.mxu1 %v2600_v19  ;;  %v101_v31 = vld [vmem:[#allocation2 + $0x120] sm:$0xff]  ;;  %v102_v33 = vld [vmem:[#allocation2 + $0x128] sm:$0xff] }
  0x1e   :  { %1185 = vmatprep.subr.bf16.mxu0 %v2607_v20  ;;  %1411 = vmatprep.subr.bf16.mxu1 %v2609_v21  ;;  %v2623_v36 = vcombine.high %v97_v30, %v101_v31  ;;  %v2625_v37 = vcombine.high %v98_v32, %v102_v33  ;;  %v105_v38 = vld [vmem:[#allocation2 + $0x140] sm:$0xff]  ;;  %v106_v40 = vld [vmem:[#allocation2 + $0x148] sm:$0xff]  ;;  %v2622_v42 = vcombine.low %v97_v30, %v101_v31 }
  0x1f   :  { %v109_v39 = vld [vmem:[#allocation2 + $0x160] sm:$0xff]  ;;  %v110_v41 = vld [vmem:[#allocation2 + $0x168] sm:$0xff]  ;;  %v2624_v43 = vcombine.low %v98_v32, %v102_v33 }
  0x20   :  { %v2631_v44 = vcombine.high %v105_v38, %v109_v39  ;;  %v2633_v45 = vcombine.high %v106_v40, %v110_v41  ;;  %v113_v46 = vld [vmem:[#allocation2 + $0x180] sm:$0xff]  ;;  %v114_v48 = vld [vmem:[#allocation2 + $0x188] sm:$0xff]  ;;  %v2630_v50 = vcombine.low %v105_v38, %v109_v39  ;;  %v2632_v51 = vcombine.low %v106_v40, %v110_v41 }
  0x21   :  { %1186 = vmatpush1.bf16.msra.mxu0 %v2606_v26  ;;  %1412 = vmatpush1.bf16.msra.mxu1 %v2608_v27  ;;  %v117_v47 = vld [vmem:[#allocation2 + $0x1a0] sm:$0xff]  ;;  %v118_v49 = vld [vmem:[#allocation2 + $0x1a8] sm:$0xff] }
  0x22   :  { %1187 = vmatprep.subr.bf16.mxu0 %v2615_v28  ;;  %1413 = vmatprep.subr.bf16.mxu1 %v2617_v29  ;;  %v2639_v52 = vcombine.high %v113_v46, %v117_v47  ;;  %v2641_v53 = vcombine.high %v114_v48, %v118_v49  ;;  %v121_v54 = vld [vmem:[#allocation2 + $0x1c0] sm:$0xff]  ;;  %v122_v57 = vld [vmem:[#allocation2 + $0x1c8] sm:$0xff]  ;;  %v2638_v59 = vcombine.low %v113_v46, %v117_v47 }
  0x23   :  { %v125_v55 = vld [vmem:[#allocation2 + $0x1e0] sm:$0xff]  ;;  %v126_v58 = vld [vmem:[#allocation2 + $0x1e8] sm:$0xff]  ;;  %v2640_v60 = vcombine.low %v114_v48, %v118_v49 }
  0x24   :  { %v3322_v56 = vld [vmem:[%s3820_s0 + $0x4] ss:$12 sps:$4 sm:$0xff]   ;;  %v2647_v61 = vcombine.high %v121_v54, %v125_v55  ;;  %v2649_v62 = vcombine.high %v122_v57, %v126_v58  ;;  %v130_v1 = vld [vmem:[#allocation2 + $0x208] sm:$0xff]  ;;  %v2646_v3 = vcombine.low %v121_v54, %v125_v55  ;;  %v2648_v4 = vcombine.low %v122_v57, %v126_v58 }
  0x25   :  { %1188 = vmatpush1.bf16.msra.mxu0 %v2614_v34  ;;  %1414 = vmatpush1.bf16.msra.mxu1 %v2616_v35  ;;  %v129_v63 = vld [vmem:[#allocation2 + $0x200] sm:$0xff]  ;;  %v134_v2 = vld [vmem:[#allocation2 + $0x228] sm:$0xff] }
  0x26   :  { %1189 = vmatprep.subr.bf16.mxu0 %v2623_v36  ;;  %1415 = vmatprep.subr.bf16.mxu1 %v2625_v37  ;;  %v133_v0 = vld [vmem:[#allocation2 + $0x220] sm:$0xff]  ;;  %v2657_v6 = vcombine.high %v130_v1, %v134_v2  ;;  %v138_v9 = vld [vmem:[#allocation2 + $0x248] sm:$0xff]  ;;  %v2656_v12 = vcombine.low %v130_v1, %v134_v2 }
  0x27   :  { %1213 = vmatprep.mubr.bf16.mxu0 %v3322_v56  ;;  %1439 = vmatprep.mubr.bf16.mxu1 %v3322_v56  ;;  %v2655_v5 = vcombine.high %v129_v63, %v133_v0  ;;  %v137_v7 = vld [vmem:[#allocation2 + $0x240] sm:$0xff]  ;;  %v142_v10 = vld [vmem:[#allocation2 + $0x268] sm:$0xff]  ;;  %v2654_v11 = vcombine.low %v129_v63, %v133_v0 }
  0x28   :  { %v141_v8 = vld [vmem:[#allocation2 + $0x260] sm:$0xff]  ;;  %v2665_v14 = vcombine.high %v138_v9, %v142_v10  ;;  %v146_v17 = vld [vmem:[#allocation2 + $0x288] sm:$0xff]  ;;  %v2664_v20 = vcombine.low %v138_v9, %v142_v10 }
  0x29   :  { %1190 = vmatpush1.bf16.msra.mxu0 %v2622_v42  ;;  %1416 = vmatpush1.bf16.msra.mxu1 %v2624_v43  ;;  %v2663_v13 = vcombine.high %v137_v7, %v141_v8  ;;  %v145_v15 = vld [vmem:[#allocation2 + $0x280] sm:$0xff]  ;;  %v150_v18 = vld [vmem:[#allocation2 + $0x2a8] sm:$0xff]  ;;  %v2662_v19 = vcombine.low %v137_v7, %v141_v8 }
  0x2a   :  { %1191 = vmatprep.subr.bf16.mxu0 %v2631_v44  ;;  %1417 = vmatprep.subr.bf16.mxu1 %v2633_v45  ;;  %v149_v16 = vld [vmem:[#allocation2 + $0x2a0] sm:$0xff]  ;;  %v2673_v22 = vcombine.high %v146_v17, %v150_v18  ;;  %v154_v25 = vld [vmem:[#allocation2 + $0x2c8] sm:$0xff]  ;;  %v2672_v28 = vcombine.low %v146_v17, %v150_v18 }
  0x2b   :  { %v2671_v21 = vcombine.high %v145_v15, %v149_v16  ;;  %v153_v23 = vld [vmem:[#allocation2 + $0x2c0] sm:$0xff]  ;;  %v158_v26 = vld [vmem:[#allocation2 + $0x2e8] sm:$0xff]  ;;  %v2670_v27 = vcombine.low %v145_v15, %v149_v16 }
  0x2c   :  { %v157_v24 = vld [vmem:[#allocation2 + $0x2e0] sm:$0xff]  ;;  %v2681_v30 = vcombine.high %v154_v25, %v158_v26  ;;  %v162_v33 = vld [vmem:[#allocation2 + $0x308] sm:$0xff]  ;;  %v2680_v36 = vcombine.low %v154_v25, %v158_v26 }
  0x2d   :  { %1192 = vmatpush1.bf16.msra.mxu0 %v2630_v50  ;;  %1418 = vmatpush1.bf16.msra.mxu1 %v2632_v51  ;;  %v2679_v29 = vcombine.high %v153_v23, %v157_v24  ;;  %v161_v31 = vld [vmem:[#allocation2 + $0x300] sm:$0xff]  ;;  %v166_v34 = vld [vmem:[#allocation2 + $0x328] sm:$0xff]  ;;  %v2678_v35 = vcombine.low %v153_v23, %v157_v24 }
  0x2e   :  { %1193 = vmatprep.subr.bf16.mxu0 %v2639_v52  ;;  %1419 = vmatprep.subr.bf16.mxu1 %v2641_v53  ;;  %v165_v32 = vld [vmem:[#allocation2 + $0x320] sm:$0xff]  ;;  %v2689_v38 = vcombine.high %v162_v33, %v166_v34  ;;  %v170_v41 = vld [vmem:[#allocation2 + $0x348] sm:$0xff]  ;;  %v2688_v44 = vcombine.low %v162_v33, %v166_v34  ;;  %v3356_v33 = vld [vmem:[#allocation2 + $0x38] sm:$0xff] }
  0x2f   :  { %v2687_v37 = vcombine.high %v161_v31, %v165_v32  ;;  %v169_v39 = vld [vmem:[#allocation2 + $0x340] sm:$0xff]  ;;  %v174_v42 = vld [vmem:[#allocation2 + $0x368] sm:$0xff]  ;;  %v2686_v43 = vcombine.low %v161_v31, %v165_v32  ;;  %v3354_v32 = vld [vmem:[#allocation2 + $0x18] sm:$0xff] }
  0x30   :  { %v173_v40 = vld [vmem:[#allocation2 + $0x360] sm:$0xff]  ;;  %v2697_v46 = vcombine.high %v170_v41, %v174_v42  ;;  %v178_v49 = vld [vmem:[#allocation2 + $0x388] sm:$0xff]  ;;  %v2696_v52 = vcombine.low %v170_v41, %v174_v42 }
  0x31   :  { %1194 = vmatpush1.bf16.msra.mxu0 %v2638_v59  ;;  %1420 = vmatpush1.bf16.msra.mxu1 %v2640_v60  ;;  %v2695_v45 = vcombine.high %v169_v39, %v173_v40  ;;  %v177_v47 = vld [vmem:[#allocation2 + $0x380] sm:$0xff]  ;;  %v182_v50 = vld [vmem:[#allocation2 + $0x3a8] sm:$0xff]  ;;  %v2694_v51 = vcombine.low %v169_v39, %v173_v40 }
  0x32   :  { %1195 = vmatprep.subr.bf16.mxu0 %v2647_v61  ;;  %1421 = vmatprep.subr.bf16.mxu1 %v2649_v62  ;;  %v181_v48 = vld [vmem:[#allocation2 + $0x3a0] sm:$0xff]  ;;  %v2705_v55 = vcombine.high %v178_v49, %v182_v50  ;;  %v186_v58 = vld [vmem:[#allocation2 + $0x3c8] sm:$0xff]  ;;  %v2704_v61 = vcombine.low %v178_v49, %v182_v50  ;;  %v3277_v49 = vmov 0   ;;  %v75_v50 = vld [vmem:[#allocation2 + $0x50] sm:$0xff] }
  0x33   :  { %v2703_v53 = vcombine.high %v177_v47, %v181_v48  ;;  %v185_v54 = vld [vmem:[#allocation2 + $0x3c0] sm:$0xff]  ;;  %v190_v59 = vld [vmem:[#allocation2 + $0x3e8] sm:$0xff]  ;;  %v2702_v60 = vcombine.low %v177_v47, %v181_v48 }
  0x34   :  { %v189_v57 = vld [vmem:[#allocation2 + $0x3e0] sm:$0xff]  ;;  %v2713_v0 = vcombine.high %v186_v58, %v190_v59  ;;  %v194_v2 = vld [vmem:[#allocation2 + $0x408] sm:$0xff] }
  0x35   :  { %1196 = vmatpush1.bf16.msra.mxu0 %v2646_v3  ;;  %1422 = vmatpush1.bf16.msra.mxu1 %v2648_v4  ;;  %v2711_v62 = vcombine.high %v185_v54, %v189_v57  ;;  %v193_v63 = vld [vmem:[#allocation2 + $0x400] sm:$0xff]  ;;  %v198_v3 = vld [vmem:[#allocation2 + $0x428] sm:$0xff]  ;;  %v2710_v4 = vcombine.low %v185_v54, %v189_v57  ;;  %v80_v54 = vld [vmem:[#allocation2 + $0x78] sm:$0xff]  ;;  %v2596_v57 = vcombine.low %v3354_v32, %v3356_v33 }
  0x36   :  { %1197 = vmatprep.subr.bf16.mxu0 %v2655_v5  ;;  %1423 = vmatprep.subr.bf16.mxu1 %v2657_v6  ;;  %v197_v1 = vld [vmem:[#allocation2 + $0x420] sm:$0xff]  ;;  %v2712_v5 = vcombine.low %v186_v58, %v190_v59  ;;  %v2721_v7 = vcombine.high %v194_v2, %v198_v3  ;;  %v3334_v15 = vld [vmem:[%s3820_s0 + $0x1c] ss:$12 sps:$4 sm:$0xff]   ;;  %v3378_v39 = vld [vmem:[%s3820_s0 + $0x4c] ss:$12 sps:$4 sm:$0xff]  }
  0x37   :  { %v2719_v6 = vcombine.high %v193_v63, %v197_v1  ;;  %v3329_v8 = vld [vmem:[%s3820_s0] ss:$12 sps:$4 sm:$0xff]   ;;  %v3387_v40 = vld [vmem:[%s3820_s0 + $0x48] ss:$12 sps:$4 sm:$0xff]   ;;  %v3392_v41 = vld [vmem:[%s3820_s0 + $0x64] ss:$12 sps:$4 sm:$0xff]  }
  0x38   :  { %v201_v9 = vld [vmem:[#allocation2 + $0x440] sm:$0xff]  ;;  %v3434_v47 = vld [vmem:[%s3820_s0 + $0xac] ss:$12 sps:$4 sm:$0xff]   ;;  %v3443_v48 = vld [vmem:[%s3820_s0 + $0xa8] ss:$12 sps:$4 sm:$0xff]  }
  0x39   :  { %1198 = vmatpush1.bf16.msra.mxu0 %v2654_v11  ;;  %1424 = vmatpush1.bf16.msra.mxu1 %v2656_v12  ;;  %v205_v10 = vld [vmem:[#allocation2 + $0x460] sm:$0xff]  ;;  %v2718_v11 = vcombine.low %v193_v63, %v197_v1  ;;  %v202_v12 = vld [vmem:[#allocation2 + $0x448] sm:$0xff]  ;;  %v88_v63 = vld [vmem:[#allocation2 + $0xb8] sm:$0xff] }
  0x3a   :  { %1199 = vmatprep.subr.bf16.mxu0 %v2663_v13  ;;  %1425 = vmatprep.subr.bf16.mxu1 %v2665_v14  ;;  %v206_v13 = vld [vmem:[#allocation2 + $0x468] sm:$0xff]  ;;  %v2720_v14 = vcombine.low %v194_v2, %v198_v3  ;;  %v2727_v16 = vcombine.high %v201_v9, %v205_v10  ;;  %v209_v17 = vld [vmem:[#allocation2 + $0x480] sm:$0xff] }
  0x3b   :  { %v213_v18 = vld [vmem:[#allocation2 + $0x4a0] sm:$0x33]  ;;  %v2728_v23 = vcombine.low %v202_v12, %v206_v13 }
  0x3c   :  { %v2735_v24 = vcombine.high %v209_v17, %v213_v18  ;;  %v2734_v26 = vcombine.low %v209_v17, %v213_v18  ;;  %v3352_v31 = vld [vmem:[%s3820_s0 + $0x34] ss:$12 sps:$4 sm:$0xff]   ;;  %v100_v17 = vld [vmem:[#allocation2 + $0x118] sm:$0xff] }
  0x3d   :  { %1200 = vmatpush1.bf16.msra.mxu0 %v2662_v19  ;;  %1426 = vmatpush1.bf16.msra.mxu1 %v2664_v20  ;;  %v2729_v19 = vcombine.high %v202_v12, %v206_v13  ;;  %v210_v20 = vld [vmem:[#allocation2 + $0x488] sm:$0xff]  ;;  %v104_v18 = vld [vmem:[#allocation2 + $0x138] sm:$0xff] }
  0x3e   :  { %1201 = vmatprep.subr.bf16.mxu0 %v2671_v21  ;;  %1427 = vmatprep.subr.bf16.mxu1 %v2673_v22  ;;  %v214_v21 = vld [vmem:[#allocation2 + $0x4a8] sm:$0x33]  ;;  %v2726_v22 = vcombine.low %v201_v9, %v205_v10  ;;  %v1158_v34 = vsel %vm1156_vm0, %v2734_v26, 0  ;;  %v96_v9 = vld [vmem:[#allocation2 + $0xf8] sm:$0xff] }
  0x3f   :  { %v2737_v25 = vcombine.high %v210_v20, %v214_v21  ;;  %v3401_v42 = vld [vmem:[%s3820_s0 + $0x60] ss:$12 sps:$4 sm:$0xff]   ;;  %v108_v26 = vld [vmem:[#allocation2 + $0x158] sm:$0xff] }
  0x41   :  { %1202 = vmatpush1.bf16.msra.mxu0 %v2670_v27  ;;  %1428 = vmatpush1.bf16.msra.mxu1 %v2672_v28  ;;  %v3343_v27 = vld [vmem:[%s3820_s0 + $0x18] ss:$12 sps:$4 sm:$0xff]   ;;  %v2736_v28 = vcombine.low %v210_v20, %v214_v21 }
  0x42   :  { %1203 = vmatprep.subr.bf16.mxu0 %v2679_v29  ;;  %1429 = vmatprep.subr.bf16.mxu1 %v2681_v30  ;;  %v3345_v29 = vld [vmem:[#allocation2 + $0x10] sm:$0xff] }
  0x43   :  { %v3347_v30 = vld [vmem:[#allocation2 + $0x30] sm:$0xff] }
  0x45   :  { %1204 = vmatpush1.bf16.msra.mxu0 %v2678_v35  ;;  %1430 = vmatpush1.bf16.msra.mxu1 %v2680_v36  ;;  %v2595_v35 = vcombine.high %v3345_v29, %v3347_v30  ;;  %v1164_v36 = vsel %vm1156_vm0, %v2736_v28, 0  ;;  %v112_v28 = vld [vmem:[#allocation2 + $0x178] sm:$0xff] }
  0x46   :  { %1205 = vmatprep.subr.bf16.mxu0 %v2687_v37  ;;  %1431 = vmatprep.subr.bf16.mxu1 %v2689_v38  ;;  %v2597_v37 = vcombine.high %v3354_v32, %v3356_v33  ;;  %v3373_v38 = vld [vmem:[%s3820_s0 + $0x30] ss:$12 sps:$4 sm:$0xff]   ;;  %v2637_v33 = vcombine.high %v108_v26, %v112_v28 }
  0x49   :  { %1206 = vmatpush1.bf16.msra.mxu0 %v2686_v43  ;;  %1432 = vmatpush1.bf16.msra.mxu1 %v2688_v44  ;;  %v3406_v43 = vld [vmem:[%s3820_s0 + $0x7c] ss:$12 sps:$4 sm:$0xff]   ;;  %v3415_v44 = vld [vmem:[%s3820_s0 + $0x78] ss:$12 sps:$4 sm:$0xff]  }
  0x4a   :  { %1207 = vmatprep.subr.bf16.mxu0 %v2695_v45  ;;  %1433 = vmatprep.subr.bf16.mxu1 %v2697_v46  ;;  %v3420_v45 = vld [vmem:[%s3820_s0 + $0x94] ss:$12 sps:$4 sm:$0xff]   ;;  %v3429_v46 = vld [vmem:[%s3820_s0 + $0x90] ss:$12 sps:$4 sm:$0xff]  }
  0x4d   :  { %1208 = vmatpush1.bf16.msra.mxu0 %v2694_v51  ;;  %1434 = vmatpush1.bf16.msra.mxu1 %v2696_v52  ;;  %v79_v51 = vld [vmem:[#allocation2 + $0x70] sm:$0xff] }
  0x4e   :  { %1209 = vmatprep.subr.bf16.mxu0 %v2703_v53  ;;  %1435 = vmatprep.subr.bf16.mxu1 %v2705_v55  ;;  %v3452_v52 = vld [vmem:[%s3820_s0 + $0x8] ss:$12 sps:$4 sm:$0xff]   ;;  %v76_v53 = vld [vmem:[#allocation2 + $0x58] sm:$0xff]  ;;  %v2594_v55 = vcombine.low %v3345_v29, %v3347_v30  ;;  %v2603_v58 = vcombine.high %v75_v50, %v79_v51  ;;  %v2628_v30 = vcombine.low %v100_v17, %v104_v18 }
  0x4f   :  { %v2605_v59 = vcombine.high %v76_v53, %v80_v54  ;;  %v2604_v1 = vcombine.low %v76_v53, %v80_v54 }
  0x51   :  { %1210 = vmatpush1.bf16.msra.mxu0 %v2702_v60  ;;  %1436 = vmatpush1.bf16.msra.mxu1 %v2704_v61  ;;  %v83_v60 = vld [vmem:[#allocation2 + $0x90] sm:$0xff] }
  0x52   :  { %1211 = vmatprep.subr.bf16.mxu0 %v2711_v62  ;;  %1437 = vmatprep.subr.bf16.mxu1 %v2713_v0  ;;  %v87_v61 = vld [vmem:[#allocation2 + $0xb0] sm:$0xff]  ;;  %v84_v62 = vld [vmem:[#allocation2 + $0x98] sm:$0xff]  ;;  %v2602_v0 = vcombine.low %v75_v50, %v79_v51  ;;  %v2636_v51 = vcombine.low %v108_v26, %v112_v28 }
  0x53   :  { %v2611_v2 = vcombine.high %v83_v60, %v87_v61  ;;  %v2613_v3 = vcombine.high %v84_v62, %v88_v63  ;;  %v2610_v10 = vcombine.low %v83_v60, %v87_v61  ;;  %v128_v60 = vld [vmem:[#allocation2 + $0x1f8] sm:$0xff] }
  0x55   :  { %1212 = vmatpush1.bf16.msra.mxu0 %v2710_v4  ;;  %1438 = vmatpush1.bf16.msra.mxu1 %v2712_v5  ;;  %v91_v4 = vld [vmem:[#allocation2 + $0xd0] sm:$0xff] }
  0x56   :  { %1294 = vmatprep.subr.bf16.mxu0 %v2719_v6  ;;  %1520 = vmatprep.subr.bf16.mxu1 %v2721_v7  ;;  %v95_v5 = vld [vmem:[#allocation2 + $0xf0] sm:$0xff]  ;;  %v3467_v6 = vld [vmem:[%s3820_s0 + $0x20] ss:$12 sps:$4 sm:$0xff]   ;;  %v92_v7 = vld [vmem:[#allocation2 + $0xd8] sm:$0xff] }
  0x57   :  { %v2619_v12 = vcombine.high %v91_v4, %v95_v5  ;;  %v2621_v13 = vcombine.high %v92_v7, %v96_v9  ;;  %v2620_v20 = vcombine.low %v92_v7, %v96_v9 }
  0x58   :  { %1214 = vmatmul.mubr.bf16.vlgmr.msra.gmra.mrb[0].mxu0 %v3329_v8  ;;  %1440 = vmatmul.mubr.bf16.vlgmr.msra.gmra.mrb[0].mxu1 %v3329_v8 }
  0x59   :  { %1295 = vmatpush1.bf16.msra.mxu0 %v2718_v11  ;;  %1521 = vmatpush1.bf16.msra.mxu1 %v2720_v14  ;;  %v2612_v11 = vcombine.low %v84_v62, %v88_v63  ;;  %v99_v14 = vld [vmem:[#allocation2 + $0x110] sm:$0xff] }
  0x5a   :  { %1223 = vmatprep.mubr.bf16.mxu0 %v3334_v15  ;;  %1449 = vmatprep.mubr.bf16.mxu1 %v3334_v15 }
  0x5b   :  { %1296 = vmatprep.subr.bf16.mxu0 %v2727_v16  ;;  %1522 = vmatprep.subr.bf16.mxu1 %v2729_v19  ;;  %v103_v16 = vld [vmem:[#allocation2 + $0x130] sm:$0xff]  ;;  %v2618_v19 = vcombine.low %v91_v4, %v95_v5  ;;  %v136_v4 = vld [vmem:[#allocation2 + $0x238] sm:$0xff] }
  0x5c   :  { %v2627_v21 = vcombine.high %v99_v14, %v103_v16  ;;  %v2626_v29 = vcombine.low %v99_v14, %v103_v16  ;;  %v140_v14 = vld [vmem:[#allocation2 + $0x258] sm:$0xff] }
  0x5d   :  { %1297 = vmatpush1.bf16.msra.mxu0 %v2726_v22  ;;  %1523 = vmatpush1.bf16.msra.mxu1 %v2728_v23  ;;  %v2629_v22 = vcombine.high %v100_v17, %v104_v18  ;;  %v107_v23 = vld [vmem:[#allocation2 + $0x150] sm:$0xff]  ;;  %v144_v16 = vld [vmem:[#allocation2 + $0x278] sm:$0xff] }
  0x5e   :  { %2742 = vmatprep.subr.msk.bf16.mxu0 %vm1156_vm0, %v2735_v24  ;;  %2751 = vmatprep.subr.msk.bf16.mxu1 %vm1156_vm0, %v2737_v25  ;;  %v111_v24 = vld [vmem:[#allocation2 + $0x170] sm:$0xff]  ;;  %v3478_v25 = vld [vmem:[%s3820_s0 + $0x38] ss:$12 sps:$4 sm:$0xff]   ;;  %v2668_v28 = vcombine.low %v140_v14, %v144_v16 }
  0x5f   :  { %v2635_v32 = vcombine.high %v107_v23, %v111_v24  ;;  %v2634_v50 = vcombine.low %v107_v23, %v111_v24  ;;  %v148_v23 = vld [vmem:[#allocation2 + $0x298] sm:$0xff] }
  0x60   :  { %1224 = vmatmul.mubr.bf16.gmra.mrb[4].mxu0 %v3343_v27  ;;  %1450 = vmatmul.mubr.bf16.gmra.mrb[4].mxu1 %v3343_v27  ;;  %v152_v24 = vld [vmem:[#allocation2 + $0x2b8] sm:$0xff] }
  0x61   :  { %1233 = vmatprep.mubr.bf16.mxu0 %v3352_v31  ;;  %1459 = vmatprep.mubr.bf16.mxu1 %v3352_v31 }
  0x62   :  { %1299 = vmatpush1.bf16.msra.mxu0 %v1158_v34  ;;  %1525 = vmatpush1.bf16.msra.mxu1 %v1164_v36  ;;  %v115_v34 = vld [vmem:[#allocation2 + $0x190] sm:$0xff]  ;;  %v116_v36 = vld [vmem:[#allocation2 + $0x198] sm:$0xff] }
  0x63   :  { %1633 = vmatprep.subr.bf16.mxu0 %v2595_v35  ;;  %1859 = vmatprep.subr.bf16.mxu1 %v2597_v37  ;;  %v119_v35 = vld [vmem:[#allocation2 + $0x1b0] sm:$0xff]  ;;  %v120_v37 = vld [vmem:[#allocation2 + $0x1b8] sm:$0xff] }
  0x64   :  { %v2643_v53 = vcombine.high %v115_v34, %v119_v35  ;;  %v2645_v54 = vcombine.high %v116_v36, %v120_v37  ;;  %v2642_v61 = vcombine.low %v115_v34, %v119_v35  ;;  %v2644_v62 = vcombine.low %v116_v36, %v120_v37  ;;  %v3511_v34 = vld [vmem:[%s3820_s0 + $0x80] ss:$12 sps:$4 sm:$0xff]   ;;  %v156_v35 = vld [vmem:[#allocation2 + $0x2d8] sm:$0xff] }
  0x65   :  { %v160_v36 = vld [vmem:[#allocation2 + $0x2f8] sm:$0xff] }
  0x68   :  { %1234 = vmatmul.mubr.bf16.gmra.mrb[8].mxu0 %v3373_v38  ;;  %1460 = vmatmul.mubr.bf16.gmra.mrb[8].mxu1 %v3373_v38 }
  0x69   :  { %1243 = vmatprep.mubr.bf16.mxu0 %v3378_v39  ;;  %1469 = vmatprep.mubr.bf16.mxu1 %v3378_v39 }
  0x70   :  { %1244 = vmatmul.mubr.bf16.gmra.mrb[12].mxu0 %v3387_v40  ;;  %1470 = vmatmul.mubr.bf16.gmra.mrb[12].mxu1 %v3387_v40 }
  0x71   :  { %1253 = vmatprep.mubr.bf16.mxu0 %v3392_v41  ;;  %1479 = vmatprep.mubr.bf16.mxu1 %v3392_v41 }
  0x78   :  { %1254 = vmatmul.mubr.bf16.gmra.mrb[16].mxu0 %v3401_v42  ;;  %1480 = vmatmul.mubr.bf16.gmra.mrb[16].mxu1 %v3401_v42 }
  0x79   :  { %1263 = vmatprep.mubr.bf16.mxu0 %v3406_v43  ;;  %1489 = vmatprep.mubr.bf16.mxu1 %v3406_v43 }
  0x80   :  { %1264 = vmatmul.mubr.bf16.gmra.mrb[20].mxu0 %v3415_v44  ;;  %1490 = vmatmul.mubr.bf16.gmra.mrb[20].mxu1 %v3415_v44 }
  0x81   :  { %1273 = vmatprep.mubr.bf16.mxu0 %v3420_v45  ;;  %1499 = vmatprep.mubr.bf16.mxu1 %v3420_v45 }
  0x88   :  { %1274 = vmatmul.mubr.bf16.gmra.mrb[24].mxu0 %v3429_v46  ;;  %1500 = vmatmul.mubr.bf16.gmra.mrb[24].mxu1 %v3429_v46 }
  0x89   :  { %1283 = vmatprep.mubr.bf16.mxu0 %v3434_v47  ;;  %1509 = vmatprep.mubr.bf16.mxu1 %v3434_v47 }
  0x90   :  { %1284 = vmatmul.mubr.bf16.gmra.mrb[28].mxu0 %v3443_v48  ;;  %1510 = vmatmul.mubr.bf16.gmra.mrb[28].mxu1 %v3443_v48 }
  0x91   :  { %1326 = vmatprep.mubr.bf16.mxu0 %v3277_v49  ;;  %1552 = vmatprep.mubr.bf16.mxu1 %v3277_v49 }
  0x98   :  { %2743 = vmatmul.mubr.msk.bf16.vlgmr.msra.gmra.mrb[0].mxu0 %vm1131_vm1, %v3452_v52  ;;  %2752 = vmatmul.mubr.msk.bf16.vlgmr.msra.gmra.mrb[0].mxu1 %vm1131_vm1, %v3452_v52 }
  0x99   :  { %1634 = vmatpush1.bf16.msra.mxu0 %v2594_v55  ;;  %1860 = vmatpush1.bf16.msra.mxu1 %v2596_v57  ;;  %v123_v55 = vld [vmem:[#allocation2 + $0x1d0] sm:$0xff] }
  0x9a   :  { %1635 = vmatprep.subr.bf16.mxu0 %v2603_v58  ;;  %1861 = vmatprep.subr.bf16.mxu1 %v2605_v59  ;;  %v127_v57 = vld [vmem:[#allocation2 + $0x1f0] sm:$0xff]  ;;  %v124_v59 = vld [vmem:[#allocation2 + $0x1d8] sm:$0xff] }
  0x9b   :  { %1336 = vmatprep.mubr.bf16.mxu0 %v3277_v49  ;;  %1562 = vmatprep.mubr.bf16.mxu1 %v3277_v49  ;;  %v3489_v58 = vld [vmem:[%s3820_s0 + $0x50] ss:$12 sps:$4 sm:$0xff]   ;;  %v2651_v63 = vcombine.high %v123_v55, %v127_v57  ;;  %v2650_v5 = vcombine.low %v123_v55, %v127_v57  ;;  %v2652_v7 = vcombine.low %v124_v59, %v128_v60 }
  0x9c   :  { %v167_v55 = vld [vmem:[#allocation2 + $0x330] sm:$0xff]  ;;  %v164_v57 = vld [vmem:[#allocation2 + $0x318] sm:$0xff] }
  0x9d   :  { %1636 = vmatpush1.bf16.msra.mxu0 %v2602_v0  ;;  %1862 = vmatpush1.bf16.msra.mxu1 %v2604_v1  ;;  %v2653_v0 = vcombine.high %v124_v59, %v128_v60  ;;  %v131_v1 = vld [vmem:[#allocation2 + $0x210] sm:$0xff]  ;;  %v168_v59 = vld [vmem:[#allocation2 + $0x338] sm:$0xff] }
  0x9e   :  { %1637 = vmatprep.subr.bf16.mxu0 %v2611_v2  ;;  %1863 = vmatprep.subr.bf16.mxu1 %v2613_v3  ;;  %v135_v2 = vld [vmem:[#allocation2 + $0x230] sm:$0xff]  ;;  %v132_v3 = vld [vmem:[#allocation2 + $0x218] sm:$0xff] }
  0x9f   :  { %v2659_v9 = vcombine.high %v131_v1, %v135_v2  ;;  %v2658_v17 = vcombine.low %v131_v1, %v135_v2  ;;  %v2660_v18 = vcombine.low %v132_v3, %v136_v4  ;;  %v175_v1 = vld [vmem:[#allocation2 + $0x370] sm:$0xff]  ;;  %v3522_v2 = vld [vmem:[%s3820_s0 + $0x98] ss:$12 sps:$4 sm:$0xff]  }
  0xa0   :  { %2744 = vmatmul.mubr.msk.bf16.gmra.mrb[4].mxu0 %vm1131_vm1, %v3467_v6  ;;  %2753 = vmatmul.mubr.msk.bf16.gmra.mrb[4].mxu1 %vm1131_vm1, %v3467_v6 }
  0xa1   :  { %1638 = vmatpush1.bf16.msra.mxu0 %v2610_v10  ;;  %1864 = vmatpush1.bf16.msra.mxu1 %v2612_v11  ;;  %v2661_v10 = vcombine.high %v132_v3, %v136_v4  ;;  %v139_v11 = vld [vmem:[#allocation2 + $0x250] sm:$0xff]  ;;  %v172_v3 = vld [vmem:[#allocation2 + $0x358] sm:$0xff] }
  0xa2   :  { %1639 = vmatprep.subr.bf16.mxu0 %v2619_v12  ;;  %1865 = vmatprep.subr.bf16.mxu1 %v2621_v13  ;;  %v143_v12 = vld [vmem:[#allocation2 + $0x270] sm:$0xff]  ;;  %v176_v4 = vld [vmem:[#allocation2 + $0x378] sm:$0xff] }
  0xa3   :  { %1346 = vmatprep.mubr.bf16.mxu0 %v3277_v49  ;;  %1572 = vmatprep.mubr.bf16.mxu1 %v3277_v49  ;;  %v3500_v13 = vld [vmem:[%s3820_s0 + $0x68] ss:$12 sps:$4 sm:$0xff]   ;;  %v2666_v26 = vcombine.low %v139_v11, %v143_v12 }
  0xa5   :  { %1640 = vmatpush1.bf16.msra.mxu0 %v2618_v19  ;;  %1866 = vmatpush1.bf16.msra.mxu1 %v2620_v20  ;;  %v2667_v19 = vcombine.high %v139_v11, %v143_v12  ;;  %v2669_v20 = vcombine.high %v140_v14, %v144_v16  ;;  %v179_v11 = vld [vmem:[#allocation2 + $0x390] sm:$0xff]  ;;  %v180_v14 = vld [vmem:[#allocation2 + $0x398] sm:$0xff] }
  0xa6   :  { %1641 = vmatprep.subr.bf16.mxu0 %v2627_v21  ;;  %1867 = vmatprep.subr.bf16.mxu1 %v2629_v22  ;;  %v147_v21 = vld [vmem:[#allocation2 + $0x290] sm:$0xff]  ;;  %v184_v16 = vld [vmem:[#allocation2 + $0x3b8] sm:$0xff] }
  0xa7   :  { %v151_v22 = vld [vmem:[#allocation2 + $0x2b0] sm:$0xff] }
  0xa8   :  { %2745 = vmatmul.mubr.msk.bf16.gmra.mrb[8].mxu0 %vm1131_vm1, %v3478_v25  ;;  %2754 = vmatmul.mubr.msk.bf16.gmra.mrb[8].mxu1 %vm1131_vm1, %v3478_v25  ;;  %v2674_v37 = vcombine.low %v147_v21, %v151_v22  ;;  %v183_v12 = vld [vmem:[#allocation2 + $0x3b0] sm:$0xff] }
  0xa9   :  { %1642 = vmatpush1.bf16.msra.mxu0 %v2626_v29  ;;  %1868 = vmatpush1.bf16.msra.mxu1 %v2628_v30  ;;  %v2675_v29 = vcombine.high %v147_v21, %v151_v22  ;;  %v2677_v30 = vcombine.high %v148_v23, %v152_v24  ;;  %v187_v21 = vld [vmem:[#allocation2 + $0x3d0] sm:$0xff] }
  0xaa   :  { %1643 = vmatprep.subr.bf16.mxu0 %v2635_v32  ;;  %1869 = vmatprep.subr.bf16.mxu1 %v2637_v33  ;;  %v155_v32 = vld [vmem:[#allocation2 + $0x2d0] sm:$0xff] }
  0xab   :  { %1356 = vmatprep.mubr.bf16.mxu0 %v3277_v49  ;;  %1582 = vmatprep.mubr.bf16.mxu1 %v3277_v49  ;;  %v159_v33 = vld [vmem:[#allocation2 + $0x2f0] sm:$0xff] }
  0xac   :  { %v2682_v60 = vcombine.low %v155_v32, %v159_v33  ;;  %v191_v22 = vld [vmem:[#allocation2 + $0x3f0] sm:$0xff] }
  0xad   :  { %1644 = vmatpush1.bf16.msra.mxu0 %v2634_v50  ;;  %1870 = vmatpush1.bf16.msra.mxu1 %v2636_v51  ;;  %v2676_v50 = vcombine.low %v148_v23, %v152_v24  ;;  %v2683_v51 = vcombine.high %v155_v32, %v159_v33  ;;  %v3533_v23 = vld [vmem:[%s3820_s0 + $0xb0] ss:$12 sps:$4 sm:$0xff]  }
  0xae   :  { %1645 = vmatprep.subr.bf16.mxu0 %v2643_v53  ;;  %1871 = vmatprep.subr.bf16.mxu1 %v2645_v54  ;;  %v2685_v53 = vcombine.high %v156_v35, %v160_v36  ;;  %v163_v54 = vld [vmem:[#allocation2 + $0x310] sm:$0xff]  ;;  %v188_v24 = vld [vmem:[#allocation2 + $0x3d8] sm:$0xff] }
  0xaf   :  { %v195_v33 = vld [vmem:[#allocation2 + $0x410] sm:$0xff] }
  0xb0   :  { %2746 = vmatmul.mubr.msk.bf16.gmra.mrb[12].mxu0 %vm1131_vm1, %v3489_v58  ;;  %2755 = vmatmul.mubr.msk.bf16.gmra.mrb[12].mxu1 %vm1131_vm1, %v3489_v58 }
  0xb1   :  { %1646 = vmatpush1.bf16.msra.mxu0 %v2642_v61  ;;  %1872 = vmatpush1.bf16.msra.mxu1 %v2644_v62  ;;  %v2684_v61 = vcombine.low %v156_v35, %v160_v36  ;;  %v2691_v62 = vcombine.high %v163_v54, %v167_v55  ;;  %v199_v35 = vld [vmem:[#allocation2 + $0x430] sm:$0xff]  ;;  %v196_v36 = vld [vmem:[#allocation2 + $0x418] sm:$0xff] }
  0xb2   :  { %1647 = vmatprep.subr.bf16.mxu0 %v2651_v63  ;;  %1873 = vmatprep.subr.bf16.mxu1 %v2653_v0  ;;  %v2693_v63 = vcombine.high %v164_v57, %v168_v59  ;;  %v171_v0 = vld [vmem:[#allocation2 + $0x350] sm:$0xff] }
  0xb3   :  { %1366 = vmatprep.mubr.bf16.mxu0 %v3277_v49  ;;  %1592 = vmatprep.mubr.bf16.mxu1 %v3277_v49 }
  0xb5   :  { %1648 = vmatpush1.bf16.msra.mxu0 %v2650_v5  ;;  %1874 = vmatpush1.bf16.msra.mxu1 %v2652_v7  ;;  %v2690_v5 = vcombine.low %v163_v54, %v167_v55  ;;  %v2692_v7 = vcombine.low %v164_v57, %v168_v59  ;;  %v203_v55 = vld [vmem:[#allocation2 + $0x450] sm:$0xff]  ;;  %v2722_v59 = vcombine.low %v195_v33, %v199_v35 }
  0xb6   :  { %1649 = vmatprep.subr.bf16.mxu0 %v2659_v9  ;;  %1875 = vmatprep.subr.bf16.mxu1 %v2661_v10  ;;  %v2699_v9 = vcombine.high %v171_v0, %v175_v1  ;;  %v2701_v10 = vcombine.high %v172_v3, %v176_v4  ;;  %v207_v57 = vld [vmem:[#allocation2 + $0x470] sm:$0xff] }
  0xb8   :  { %2747 = vmatmul.mubr.msk.bf16.gmra.mrb[16].mxu0 %vm1131_vm1, %v3500_v13  ;;  %2756 = vmatmul.mubr.msk.bf16.gmra.mrb[16].mxu1 %vm1131_vm1, %v3500_v13 }
  0xb9   :  { %1650 = vmatpush1.bf16.msra.mxu0 %v2658_v17  ;;  %1876 = vmatpush1.bf16.msra.mxu1 %v2660_v18  ;;  %v2698_v17 = vcombine.low %v171_v0, %v175_v1  ;;  %v2700_v18 = vcombine.low %v172_v3, %v176_v4  ;;  %v211_v0 = vld [vmem:[#allocation2 + $0x490] sm:$0xff]  ;;  %v212_v4 = vld [vmem:[#allocation2 + $0x498] sm:$0xff] }
  0xba   :  { %1651 = vmatprep.subr.bf16.mxu0 %v2667_v19  ;;  %1877 = vmatprep.subr.bf16.mxu1 %v2669_v20  ;;  %v2707_v19 = vcombine.high %v179_v11, %v183_v12  ;;  %v2709_v20 = vcombine.high %v180_v14, %v184_v16  ;;  %v215_v1 = vld [vmem:[#allocation2 + $0x4b0] sm:$0x33] }
  0xbb   :  { %1376 = vmatprep.mubr.bf16.mxu0 %v3277_v49  ;;  %1602 = vmatprep.mubr.bf16.mxu1 %v3277_v49 }
  0xbd   :  { %1652 = vmatpush1.bf16.msra.mxu0 %v2666_v26  ;;  %1878 = vmatpush1.bf16.msra.mxu1 %v2668_v28  ;;  %v192_v26 = vld [vmem:[#allocation2 + $0x3f8] sm:$0xff]  ;;  %v2706_v28 = vcombine.low %v179_v11, %v183_v12  ;;  %v2738_v11 = vcombine.low %v211_v0, %v215_v1 }
  0xbe   :  { %1653 = vmatprep.subr.bf16.mxu0 %v2675_v29  ;;  %1879 = vmatprep.subr.bf16.mxu1 %v2677_v30  ;;  %v2708_v29 = vcombine.low %v180_v14, %v184_v16  ;;  %v2715_v30 = vcombine.high %v187_v21, %v191_v22  ;;  %v2717_v32 = vcombine.high %v188_v24, %v192_v26 }
  0xc0   :  { %2748 = vmatmul.mubr.msk.bf16.gmra.mrb[20].mxu0 %vm1131_vm1, %v3511_v34  ;;  %2757 = vmatmul.mubr.msk.bf16.gmra.mrb[20].mxu1 %vm1131_vm1, %v3511_v34 }
  0xc1   :  { %1654 = vmatpush1.bf16.msra.mxu0 %v2674_v37  ;;  %1880 = vmatpush1.bf16.msra.mxu1 %v2676_v50  ;;  %v200_v37 = vld [vmem:[#allocation2 + $0x438] sm:$0xff]  ;;  %v2714_v50 = vcombine.low %v187_v21, %v191_v22 }
  0xc2   :  { %1655 = vmatprep.subr.bf16.mxu0 %v2683_v51  ;;  %1881 = vmatprep.subr.bf16.mxu1 %v2685_v53  ;;  %v2716_v51 = vcombine.low %v188_v24, %v192_v26  ;;  %v2723_v53 = vcombine.high %v195_v33, %v199_v35  ;;  %v2725_v54 = vcombine.high %v196_v36, %v200_v37 }
  0xc3   :  { %1386 = vmatprep.mubr.bf16.mxu0 %v3277_v49  ;;  %1612 = vmatprep.mubr.bf16.mxu1 %v3277_v49 }
  0xc5   :  { %1656 = vmatpush1.bf16.msra.mxu0 %v2682_v60  ;;  %1882 = vmatpush1.bf16.msra.mxu1 %v2684_v61  ;;  %v204_v60 = vld [vmem:[#allocation2 + $0x458] sm:$0xff] }
  0xc6   :  { %1657 = vmatprep.subr.bf16.mxu0 %v2691_v62  ;;  %1883 = vmatprep.subr.bf16.mxu1 %v2693_v63  ;;  %v208_v61 = vld [vmem:[#allocation2 + $0x478] sm:$0xff]  ;;  %v2724_v62 = vcombine.low %v196_v36, %v200_v37  ;;  %v2731_v63 = vcombine.high %v203_v55, %v207_v57 }
  0xc7   :  { %v2733_v3 = vcombine.high %v204_v60, %v208_v61 }
  0xc8   :  { %2749 = vmatmul.mubr.msk.bf16.gmra.mrb[24].mxu0 %vm1131_vm1, %v3522_v2  ;;  %2758 = vmatmul.mubr.msk.bf16.gmra.mrb[24].mxu1 %vm1131_vm1, %v3522_v2 }
  0xc9   :  { %1658 = vmatpush1.bf16.msra.mxu0 %v2690_v5  ;;  %1884 = vmatpush1.bf16.msra.mxu1 %v2692_v7  ;;  %v216_v5 = vld [vmem:[#allocation2 + $0x4b8] sm:$0x33]  ;;  %v2732_v7 = vcombine.low %v204_v60, %v208_v61 }
  0xca   :  { %1659 = vmatprep.subr.bf16.mxu0 %v2699_v9  ;;  %1885 = vmatprep.subr.bf16.mxu1 %v2701_v10  ;;  %v2739_v9 = vcombine.high %v211_v0, %v215_v1  ;;  %v2741_v10 = vcombine.high %v212_v4, %v216_v5  ;;  %v2740_v12 = vcombine.low %v212_v4, %v216_v5 }
  0xcb   :  { %1396 = vmatprep.mubr.bf16.mxu0 %v3277_v49  ;;  %1622 = vmatprep.mubr.bf16.mxu1 %v3277_v49 }
  0xcc   :  { %v1176_v14 = vsel %vm1156_vm0, %v2740_v12, 0 }
  0xcd   :  { %1660 = vmatpush1.bf16.msra.mxu0 %v2698_v17  ;;  %1886 = vmatpush1.bf16.msra.mxu1 %v2700_v18 }
  0xce   :  { %1661 = vmatprep.subr.bf16.mxu0 %v2707_v19  ;;  %1887 = vmatprep.subr.bf16.mxu1 %v2709_v20 }
  0xd0   :  { %2750 = vmatmul.mubr.msk.bf16.gmra.mrb[28].mxu0 %vm1131_vm1, %v3533_v23  ;;  %2759 = vmatmul.mubr.msk.bf16.gmra.mrb[28].mxu1 %vm1131_vm1, %v3533_v23 }
  0xd1   :  { %1662 = vmatpush1.bf16.msra.mxu0 %v2706_v28  ;;  %1888 = vmatpush1.bf16.msra.mxu1 %v2708_v29 }
  0xd2   :  { %1663 = vmatprep.subr.bf16.mxu0 %v2715_v30  ;;  %1889 = vmatprep.subr.bf16.mxu1 %v2717_v32 }
  0xd3   :  { %1665 = vmatprep.mubr.bf16.mxu0 %v3322_v56  ;;  %1891 = vmatprep.mubr.bf16.mxu1 %v3322_v56  ;;  %v2730_v56 = vcombine.low %v203_v55, %v207_v57 }
  0xd5   :  { %1664 = vmatpush1.bf16.msra.mxu0 %v2714_v50  ;;  %1890 = vmatpush1.bf16.msra.mxu1 %v2716_v51 }
  0xd6   :  { %1746 = vmatprep.subr.bf16.mxu0 %v2723_v53  ;;  %1972 = vmatprep.subr.bf16.mxu1 %v2725_v54 }
  0xd8   :  { %1666 = vmatmul.mubr.bf16.vlgmr.msra.gmra.mrb[32].mxu0 %v3329_v8  ;;  %1892 = vmatmul.mubr.bf16.vlgmr.msra.gmra.mrb[32].mxu1 %v3329_v8  ;;  %v1170_v8 = vsel %vm1156_vm0, %v2738_v11, 0 }
  0xd9   :  { %1747 = vmatpush1.bf16.msra.mxu0 %v2722_v59  ;;  %1973 = vmatpush1.bf16.msra.mxu1 %v2724_v62 }
  0xda   :  { %1675 = vmatprep.mubr.bf16.mxu0 %v3334_v15  ;;  %1901 = vmatprep.mubr.bf16.mxu1 %v3334_v15  ;;  %v219_v15 = vlaneseq }
  0xdb   :  { %1748 = vmatprep.subr.bf16.mxu0 %v2731_v63  ;;  %1974 = vmatprep.subr.bf16.mxu1 %v2733_v3 }
  0xdd   :  { %1749 = vmatpush1.bf16.msra.mxu0 %v2730_v56  ;;  %1975 = vmatpush1.bf16.msra.mxu1 %v2732_v7 }
  0xde   :  { %2760 = vmatprep.subr.msk.bf16.mxu0 %vm1156_vm0, %v2739_v9  ;;  %2769 = vmatprep.subr.msk.bf16.mxu1 %vm1156_vm0, %v2741_v10 }
  0xe0   :  { %1676 = vmatmul.mubr.bf16.gmra.mrb[36].mxu0 %v3343_v27  ;;  %1902 = vmatmul.mubr.bf16.gmra.mrb[36].mxu1 %v3343_v27  ;;  %v3623_v27 = vshrl.u32 %v219_v15, 7 }
  0xe1   :  { %1685 = vmatprep.mubr.bf16.mxu0 %v3352_v31  ;;  %1911 = vmatprep.mubr.bf16.mxu1 %v3352_v31 }
  0xe2   :  { %1751 = vmatpush1.bf16.msra.mxu0 %v1170_v8  ;;  %1977 = vmatpush1.bf16.msra.mxu1 %v1176_v14  ;;  %v221_v31 = vsub.s32 0, %v3623_v27 }
  0xe8   :  { %1686 = vmatmul.mubr.bf16.gmra.mrb[40].mxu0 %v3373_v38  ;;  %1912 = vmatmul.mubr.bf16.gmra.mrb[40].mxu1 %v3373_v38  ;;  %v3629_v38 = vld [vmem:[%s3822_s2] sm:$0xff]  ;;  %s3278_s2 = smov [#allocation5]  }
  0xe9   :  { %1695 = vmatprep.mubr.bf16.mxu0 %v3378_v39  ;;  %1921 = vmatprep.mubr.bf16.mxu1 %v3378_v39  ;;  %v229_v39 = vsub.s32 2, %v3623_v27  ;;  %s2538_s24 = sshll.u32 %s3278_s2, 4  ;;  %s2539_s24 = int_to_ptr.vmem [resolvable:$true] %s2538_s24 }
  0xea   :  { %s3224_s25 = scalar_lea.vmem %s2539_s24, 4096  ;;  %p3229_p9 = scmp.lt.s32.totalorder %s2539_s24, %s2539_s24 }
  0xeb   :  { %p3225_p8 = scmp.ne.s32.totalorder %s2539_s24, %s3224_s25  ;;  %p3230_p10 = scmp.lt.s32.totalorder %s3224_s25, %s3224_s25 }
  0xed   :  { %p3231_p11 = por %p3230_p10, %p3229_p9 }
  0xef   :  { %p3232_p12 = pnand %p3231_p11, %p3225_p8 }
  0xf0   :  { %1696 = vmatmul.mubr.bf16.gmra.mrb[44].mxu0 %v3387_v40  ;;  %1922 = vmatmul.mubr.bf16.gmra.mrb[44].mxu1 %v3387_v40  ;;  %v225_v40 = vsub.s32 1, %v3623_v27 }
  0xf1   :  { %1705 = vmatprep.mubr.bf16.mxu0 %v3392_v41  ;;  %1931 = vmatprep.mubr.bf16.mxu1 %v3392_v41  ;;  %v233_v41 = vsub.s32 3, %v3623_v27 }
  0xf8   :  { %1706 = vmatmul.mubr.bf16.gmra.mrb[48].mxu0 %v3401_v42  ;;  %1932 = vmatmul.mubr.bf16.gmra.mrb[48].mxu1 %v3401_v42  ;;  %v3635_v42 = vrot.slane %v3629_v38, %v221_v31 }
  0xf9   :  { %1715 = vmatprep.mubr.bf16.mxu0 %v3406_v43  ;;  %1941 = vmatprep.mubr.bf16.mxu1 %v3406_v43  ;;  %v3638_v43 = vrot.slane %v3629_v38, %v229_v39 }
 0x100   :  { %1716 = vmatmul.mubr.bf16.gmra.mrb[52].mxu0 %v3415_v44  ;;  %1942 = vmatmul.mubr.bf16.gmra.mrb[52].mxu1 %v3415_v44  ;;  %v3641_v44 = vrot.slane %v3629_v38, %v225_v40 }
 0x101   :  { %1725 = vmatprep.mubr.bf16.mxu0 %v3420_v45  ;;  %1951 = vmatprep.mubr.bf16.mxu1 %v3420_v45  ;;  %v3644_v45 = vrot.slane %v3629_v38, %v233_v41 }
 0x108   :  { %1726 = vmatmul.mubr.bf16.gmra.mrb[56].mxu0 %v3429_v46  ;;  %1952 = vmatmul.mubr.bf16.gmra.mrb[56].mxu1 %v3429_v46 }
 0x109   :  { %1735 = vmatprep.mubr.bf16.mxu0 %v3434_v47  ;;  %1961 = vmatprep.mubr.bf16.mxu1 %v3434_v47 }
 0x110   :  { %1736 = vmatmul.mubr.bf16.gmra.mrb[60].mxu0 %v3443_v48  ;;  %1962 = vmatmul.mubr.bf16.gmra.mrb[60].mxu1 %v3443_v48 }
 0x111   :  { %1778 = vmatprep.mubr.bf16.mxu0 %v3277_v49  ;;  %2004 = vmatprep.mubr.bf16.mxu1 %v3277_v49 }
 0x118   :  { %2761 = vmatmul.mubr.msk.bf16.vlgmr.msra.gmra.mrb[32].mxu0 %vm1131_vm1, %v3452_v52  ;;  %2770 = vmatmul.mubr.msk.bf16.vlgmr.msra.gmra.mrb[32].mxu1 %vm1131_vm1, %v3452_v52 }
 0x119   :  { %1788 = vmatprep.mubr.bf16.mxu0 %v3277_v49  ;;  %2014 = vmatprep.mubr.bf16.mxu1 %v3277_v49 }
 0x120   :  { %2762 = vmatmul.mubr.msk.bf16.gmra.mrb[36].mxu0 %vm1131_vm1, %v3467_v6  ;;  %2771 = vmatmul.mubr.msk.bf16.gmra.mrb[36].mxu1 %vm1131_vm1, %v3467_v6 }
 0x121   :  { %1798 = vmatprep.mubr.bf16.mxu0 %v3277_v49  ;;  %2024 = vmatprep.mubr.bf16.mxu1 %v3277_v49 }
 0x128   :  { %2763 = vmatmul.mubr.msk.bf16.gmra.mrb[40].mxu0 %vm1131_vm1, %v3478_v25  ;;  %2772 = vmatmul.mubr.msk.bf16.gmra.mrb[40].mxu1 %vm1131_vm1, %v3478_v25 }
 0x129   :  { %1808 = vmatprep.mubr.bf16.mxu0 %v3277_v49  ;;  %2034 = vmatprep.mubr.bf16.mxu1 %v3277_v49 }
 0x130   :  { %2764 = vmatmul.mubr.msk.bf16.gmra.mrb[44].mxu0 %vm1131_vm1, %v3489_v58  ;;  %2773 = vmatmul.mubr.msk.bf16.gmra.mrb[44].mxu1 %vm1131_vm1, %v3489_v58 }
 0x131   :  { %1818 = vmatprep.mubr.bf16.mxu0 %v3277_v49  ;;  %2044 = vmatprep.mubr.bf16.mxu1 %v3277_v49 }
 0x138   :  { %2765 = vmatmul.mubr.msk.bf16.gmra.mrb[48].mxu0 %vm1131_vm1, %v3500_v13  ;;  %2774 = vmatmul.mubr.msk.bf16.gmra.mrb[48].mxu1 %vm1131_vm1, %v3500_v13 }
 0x139   :  { %1828 = vmatprep.mubr.bf16.mxu0 %v3277_v49  ;;  %2054 = vmatprep.mubr.bf16.mxu1 %v3277_v49 }
 0x140   :  { %2766 = vmatmul.mubr.msk.bf16.gmra.mrb[52].mxu0 %vm1131_vm1, %v3511_v34  ;;  %2775 = vmatmul.mubr.msk.bf16.gmra.mrb[52].mxu1 %vm1131_vm1, %v3511_v34 }
 0x141   :  { %1838 = vmatprep.mubr.bf16.mxu0 %v3277_v49  ;;  %2064 = vmatprep.mubr.bf16.mxu1 %v3277_v49 }
 0x148   :  { %2767 = vmatmul.mubr.msk.bf16.gmra.mrb[56].mxu0 %vm1131_vm1, %v3522_v2  ;;  %2776 = vmatmul.mubr.msk.bf16.gmra.mrb[56].mxu1 %vm1131_vm1, %v3522_v2 }
 0x149   :  { %1848 = vmatprep.mubr.bf16.mxu0 %v3277_v49  ;;  %2074 = vmatprep.mubr.bf16.mxu1 %v3277_v49 }
 0x150   :  { %2768 = vmatmul.mubr.msk.bf16.gmra.mrb[60].mxu0 %vm1131_vm1, %v3533_v23  ;;  %2777 = vmatmul.mubr.msk.bf16.gmra.mrb[60].mxu1 %vm1131_vm1, %v3533_v23 }
 0x16b   :  { %v1328_v46 = vpop.f32.mrb[0].mxu0  ;;  %v1554_v48 = vpop.f32.mrb[0].mxu1 }
 0x16c   :  { %v2906_v47 = vadd.f32 %v1328_v46, %v3635_v42  ;;  %v1330_v49 = vpop.f32.mrb[1].mxu0  ;;  %v2938_v52 = vadd.f32 %v1554_v48, %v3638_v43  ;;  %v1556_v25 = vpop.f32.mrb[1].mxu1 }
 0x16d   :  { %v2907_v6 = vadd.f32 %v1330_v49, %v3641_v44  ;;  %v1332_v58 = vpop.f32.mrb[2].mxu0  ;;  %v2939_v13 = vadd.f32 %v1556_v25, %v3644_v45  ;;  %v1558_v2 = vpop.f32.mrb[2].mxu1 }
 0x16e   :  { %v2908_v34 = vadd.f32 %v1332_v58, %v3635_v42  ;;  %v1334_v16 = vpop.f32.mrb[3].mxu0  ;;  %v2940_v18 = vadd.f32 %v1558_v2, %v3638_v43  ;;  %v1560_v20 = vpop.f32.mrb[3].mxu1 }
 0x16f   :  { %v2842_v17 = vpack.c.bf16 %v2907_v6, %v2906_v47  ;;  %v2909_v19 = vadd.f32 %v1334_v16, %v3641_v44  ;;  %v2843_v21 = vpack.c.bf16 %v2939_v13, %v2938_v52  ;;  %v2941_v22 = vadd.f32 %v1560_v20, %v3644_v45 }
 0x171   :  { %2277 = vst [vmem:[#allocation5] sm:$0xff] %v2842_v17  ;;  %v2844_v23 = vpack.c.bf16 %v2909_v19, %v2908_v34  ;;  %2278 = vst [vmem:[#allocation5 + $0x8] sm:$0xff] %v2843_v21  ;;  %v2845_v24 = vpack.c.bf16 %v2941_v22, %v2940_v18 }
 0x173   :  { %2279 = vst [vmem:[#allocation5 + $0x10] sm:$0xff] %v2844_v23  ;;  %v1338_v26 = vpop.f32.mrb[4].mxu0  ;;  %2280 = vst [vmem:[#allocation5 + $0x18] sm:$0xff] %v2845_v24  ;;  %v1564_v29 = vpop.f32.mrb[4].mxu1 }
 0x174   :  { %v2910_v28 = vadd.f32 %v1338_v26, %v3635_v42  ;;  %v1340_v30 = vpop.f32.mrb[5].mxu0  ;;  %v2942_v32 = vadd.f32 %v1564_v29, %v3638_v43  ;;  %v1566_v35 = vpop.f32.mrb[5].mxu1 }
 0x175   :  { %v2911_v33 = vadd.f32 %v1340_v30, %v3641_v44  ;;  %v1342_v36 = vpop.f32.mrb[6].mxu0  ;;  %v2943_v37 = vadd.f32 %v1566_v35, %v3644_v45  ;;  %v1568_v51 = vpop.f32.mrb[6].mxu1 }
 0x176   :  { %v2912_v50 = vadd.f32 %v1342_v36, %v3635_v42  ;;  %v1344_v53 = vpop.f32.mrb[7].mxu0  ;;  %v2944_v55 = vadd.f32 %v1568_v51, %v3638_v43  ;;  %v1570_v59 = vpop.f32.mrb[7].mxu1 }
 0x177   :  { %v2846_v54 = vpack.c.bf16 %v2911_v33, %v2910_v28  ;;  %v2913_v57 = vadd.f32 %v1344_v53, %v3641_v44  ;;  %v2847_v60 = vpack.c.bf16 %v2943_v37, %v2942_v32  ;;  %v2945_v61 = vadd.f32 %v1570_v59, %v3644_v45 }
 0x179   :  { %2281 = vst [vmem:[#allocation5 + $0x20] sm:$0xff] %v2846_v54  ;;  %v2848_v62 = vpack.c.bf16 %v2913_v57, %v2912_v50  ;;  %2282 = vst [vmem:[#allocation5 + $0x28] sm:$0xff] %v2847_v60  ;;  %v2849_v63 = vpack.c.bf16 %v2945_v61, %v2944_v55 }
 0x17b   :  { %2283 = vst [vmem:[#allocation5 + $0x30] sm:$0xff] %v2848_v62  ;;  %v1348_v0 = vpop.f32.mrb[8].mxu0  ;;  %2284 = vst [vmem:[#allocation5 + $0x38] sm:$0xff] %v2849_v63  ;;  %v1574_v3 = vpop.f32.mrb[8].mxu1 }
 0x17c   :  { %v2914_v1 = vadd.f32 %v1348_v0, %v3635_v42  ;;  %v1350_v4 = vpop.f32.mrb[9].mxu0  ;;  %v2946_v5 = vadd.f32 %v1574_v3, %v3638_v43  ;;  %v1576_v7 = vpop.f32.mrb[9].mxu1 }
 0x17d   :  { %v2915_v56 = vadd.f32 %v1350_v4, %v3641_v44  ;;  %v1352_v9 = vpop.f32.mrb[10].mxu0  ;;  %v2947_v10 = vadd.f32 %v1576_v7, %v3644_v45  ;;  %v1578_v12 = vpop.f32.mrb[10].mxu1 }
 0x17e   :  { %v2916_v11 = vadd.f32 %v1352_v9, %v3635_v42  ;;  %v1354_v8 = vpop.f32.mrb[11].mxu0  ;;  %v2948_v15 = vadd.f32 %v1578_v12, %v3638_v43  ;;  %v1580_v39 = vpop.f32.mrb[11].mxu1 }
 0x17f   :  { %v2850_v14 = vpack.c.bf16 %v2915_v56, %v2914_v1  ;;  %v2917_v31 = vadd.f32 %v1354_v8, %v3641_v44  ;;  %v2851_v40 = vpack.c.bf16 %v2947_v10, %v2946_v5  ;;  %v2949_v41 = vadd.f32 %v1580_v39, %v3644_v45 }
 0x181   :  { %2285 = vst [vmem:[#allocation5 + $0x40] sm:$0xff] %v2850_v14  ;;  %v2852_v46 = vpack.c.bf16 %v2917_v31, %v2916_v11  ;;  %2286 = vst [vmem:[#allocation5 + $0x48] sm:$0xff] %v2851_v40  ;;  %v2853_v47 = vpack.c.bf16 %v2949_v41, %v2948_v15 }
 0x183   :  { %2287 = vst [vmem:[#allocation5 + $0x50] sm:$0xff] %v2852_v46  ;;  %v1358_v48 = vpop.f32.mrb[12].mxu0  ;;  %2288 = vst [vmem:[#allocation5 + $0x58] sm:$0xff] %v2853_v47  ;;  %v1584_v52 = vpop.f32.mrb[12].mxu1 }
 0x184   :  { %v2918_v49 = vadd.f32 %v1358_v48, %v3635_v42  ;;  %v1360_v6 = vpop.f32.mrb[13].mxu0  ;;  %v2950_v25 = vadd.f32 %v1584_v52, %v3638_v43  ;;  %v1586_v13 = vpop.f32.mrb[13].mxu1 }
 0x185   :  { %v2919_v58 = vadd.f32 %v1360_v6, %v3641_v44  ;;  %v1362_v34 = vpop.f32.mrb[14].mxu0  ;;  %v2951_v2 = vadd.f32 %v1586_v13, %v3644_v45  ;;  %v1588_v17 = vpop.f32.mrb[14].mxu1 }
 0x186   :  { %v2920_v16 = vadd.f32 %v1362_v34, %v3635_v42  ;;  %v1364_v18 = vpop.f32.mrb[15].mxu0  ;;  %v2952_v20 = vadd.f32 %v1588_v17, %v3638_v43  ;;  %v1590_v22 = vpop.f32.mrb[15].mxu1 }
 0x187   :  { %v2854_v19 = vpack.c.bf16 %v2919_v58, %v2918_v49  ;;  %v2921_v21 = vadd.f32 %v1364_v18, %v3641_v44  ;;  %v2855_v23 = vpack.c.bf16 %v2951_v2, %v2950_v25  ;;  %v2953_v24 = vadd.f32 %v1590_v22, %v3644_v45 }
 0x189   :  { %2289 = vst [vmem:[#allocation5 + $0x60] sm:$0xff] %v2854_v19  ;;  %v2856_v26 = vpack.c.bf16 %v2921_v21, %v2920_v16  ;;  %2290 = vst [vmem:[#allocation5 + $0x68] sm:$0xff] %v2855_v23  ;;  %v2857_v28 = vpack.c.bf16 %v2953_v24, %v2952_v20 }
 0x18b   :  { %2291 = vst [vmem:[#allocation5 + $0x70] sm:$0xff] %v2856_v26  ;;  %v1368_v29 = vpop.f32.mrb[16].mxu0  ;;  %2292 = vst [vmem:[#allocation5 + $0x78] sm:$0xff] %v2857_v28  ;;  %v1594_v32 = vpop.f32.mrb[16].mxu1 }
 0x18c   :  { %v2922_v30 = vadd.f32 %v1368_v29, %v3635_v42  ;;  %v1370_v33 = vpop.f32.mrb[17].mxu0  ;;  %v2954_v35 = vadd.f32 %v1594_v32, %v3638_v43  ;;  %v1596_v37 = vpop.f32.mrb[17].mxu1 }
 0x18d   :  { %v2923_v36 = vadd.f32 %v1370_v33, %v3641_v44  ;;  %v1372_v50 = vpop.f32.mrb[18].mxu0  ;;  %v2955_v51 = vadd.f32 %v1596_v37, %v3644_v45  ;;  %v1598_v54 = vpop.f32.mrb[18].mxu1 }
 0x18e   :  { %v2924_v53 = vadd.f32 %v1372_v50, %v3635_v42  ;;  %v1374_v55 = vpop.f32.mrb[19].mxu0  ;;  %v2956_v59 = vadd.f32 %v1598_v54, %v3638_v43  ;;  %v1600_v61 = vpop.f32.mrb[19].mxu1 }
 0x18f   :  { %v2858_v57 = vpack.c.bf16 %v2923_v36, %v2922_v30  ;;  %v2925_v60 = vadd.f32 %v1374_v55, %v3641_v44  ;;  %v2859_v62 = vpack.c.bf16 %v2955_v51, %v2954_v35  ;;  %v2957_v63 = vadd.f32 %v1600_v61, %v3644_v45 }
 0x191   :  { %2293 = vst [vmem:[#allocation5 + $0x80] sm:$0xff] %v2858_v57  ;;  %v2860_v0 = vpack.c.bf16 %v2925_v60, %v2924_v53  ;;  %2294 = vst [vmem:[#allocation5 + $0x88] sm:$0xff] %v2859_v62  ;;  %v2861_v1 = vpack.c.bf16 %v2957_v63, %v2956_v59 }
 0x193   :  { %2295 = vst [vmem:[#allocation5 + $0x90] sm:$0xff] %v2860_v0  ;;  %v1378_v3 = vpop.f32.mrb[20].mxu0  ;;  %2296 = vst [vmem:[#allocation5 + $0x98] sm:$0xff] %v2861_v1  ;;  %v1604_v5 = vpop.f32.mrb[20].mxu1 }
 0x194   :  { %v2926_v4 = vadd.f32 %v1378_v3, %v3635_v42  ;;  %v1380_v56 = vpop.f32.mrb[21].mxu0  ;;  %v2958_v7 = vadd.f32 %v1604_v5, %v3638_v43  ;;  %v1606_v10 = vpop.f32.mrb[21].mxu1 }
 0x195   :  { %v2927_v9 = vadd.f32 %v1380_v56, %v3641_v44  ;;  %v1382_v11 = vpop.f32.mrb[22].mxu0  ;;  %v2959_v12 = vadd.f32 %v1606_v10, %v3644_v45  ;;  %v1608_v14 = vpop.f32.mrb[22].mxu1 }
 0x196   :  { %v2928_v8 = vadd.f32 %v1382_v11, %v3635_v42  ;;  %v1384_v15 = vpop.f32.mrb[23].mxu0  ;;  %v2960_v39 = vadd.f32 %v1608_v14, %v3638_v43  ;;  %v1610_v41 = vpop.f32.mrb[23].mxu1 }
 0x197   :  { %v2862_v31 = vpack.c.bf16 %v2927_v9, %v2926_v4  ;;  %v2929_v40 = vadd.f32 %v1384_v15, %v3641_v44  ;;  %v2863_v46 = vpack.c.bf16 %v2959_v12, %v2958_v7  ;;  %v2961_v47 = vadd.f32 %v1610_v41, %v3644_v45 }
 0x199   :  { %2297 = vst [vmem:[#allocation5 + $0xa0] sm:$0xff] %v2862_v31  ;;  %v2864_v48 = vpack.c.bf16 %v2929_v40, %v2928_v8  ;;  %2298 = vst [vmem:[#allocation5 + $0xa8] sm:$0xff] %v2863_v46  ;;  %v2865_v49 = vpack.c.bf16 %v2961_v47, %v2960_v39 }
 0x19b   :  { %2299 = vst [vmem:[#allocation5 + $0xb0] sm:$0xff] %v2864_v48  ;;  %v1388_v52 = vpop.f32.mrb[24].mxu0  ;;  %2300 = vst [vmem:[#allocation5 + $0xb8] sm:$0xff] %v2865_v49  ;;  %v1614_v25 = vpop.f32.mrb[24].mxu1 }
 0x19c   :  { %v2930_v6 = vadd.f32 %v1388_v52, %v3635_v42  ;;  %v1390_v58 = vpop.f32.mrb[25].mxu0  ;;  %v2962_v13 = vadd.f32 %v1614_v25, %v3638_v43  ;;  %v1616_v2 = vpop.f32.mrb[25].mxu1 }
 0x19d   :  { %v2931_v34 = vadd.f32 %v1390_v58, %v3641_v44  ;;  %v1392_v16 = vpop.f32.mrb[26].mxu0  ;;  %v2963_v17 = vadd.f32 %v1616_v2, %v3644_v45  ;;  %v1618_v19 = vpop.f32.mrb[26].mxu1 }
 0x19e   :  { %v2932_v18 = vadd.f32 %v1392_v16, %v3635_v42  ;;  %v1394_v20 = vpop.f32.mrb[27].mxu0  ;;  %v2964_v22 = vadd.f32 %v1618_v19, %v3638_v43  ;;  %v1620_v24 = vpop.f32.mrb[27].mxu1 }
 0x19f   :  { %v2866_v21 = vpack.c.bf16 %v2931_v34, %v2930_v6  ;;  %v2933_v23 = vadd.f32 %v1394_v20, %v3641_v44  ;;  %v2867_v26 = vpack.c.bf16 %v2963_v17, %v2962_v13  ;;  %v2965_v28 = vadd.f32 %v1620_v24, %v3644_v45 }
 0x1a1   :  { %2301 = vst [vmem:[#allocation5 + $0xc0] sm:$0xff] %v2866_v21  ;;  %v2868_v29 = vpack.c.bf16 %v2933_v23, %v2932_v18  ;;  %2302 = vst [vmem:[#allocation5 + $0xc8] sm:$0xff] %v2867_v26  ;;  %v2869_v30 = vpack.c.bf16 %v2965_v28, %v2964_v22 }
 0x1a3   :  { %2303 = vst [vmem:[#allocation5 + $0xd0] sm:$0xff] %v2868_v29  ;;  %v1398_v32 = vpop.f32.mrb[28].mxu0  ;;  %2304 = vst [vmem:[#allocation5 + $0xd8] sm:$0xff] %v2869_v30  ;;  %v1624_v35 = vpop.f32.mrb[28].mxu1 }
 0x1a4   :  { %v2934_v33 = vadd.f32 %v1398_v32, %v3635_v42  ;;  %v1400_v36 = vpop.f32.mrb[29].mxu0  ;;  %v2966_v37 = vadd.f32 %v1624_v35, %v3638_v43  ;;  %v1626_v51 = vpop.f32.mrb[29].mxu1 }
 0x1a5   :  { %v2935_v50 = vadd.f32 %v1400_v36, %v3641_v44  ;;  %v1402_v53 = vpop.f32.mrb[30].mxu0  ;;  %v2967_v54 = vadd.f32 %v1626_v51, %v3644_v45  ;;  %v1628_v57 = vpop.f32.mrb[30].mxu1 }
 0x1a6   :  { %v2936_v55 = vadd.f32 %v1402_v53, %v3635_v42  ;;  %v1404_v59 = vpop.f32.mrb[31].mxu0  ;;  %v2968_v61 = vadd.f32 %v1628_v57, %v3638_v43  ;;  %v1630_v63 = vpop.f32.mrb[31].mxu1 }
 0x1a7   :  { %v2870_v60 = vpack.c.bf16 %v2935_v50, %v2934_v33  ;;  %v2937_v62 = vadd.f32 %v1404_v59, %v3641_v44  ;;  %v2871_v0 = vpack.c.bf16 %v2967_v54, %v2966_v37  ;;  %v2969_v1 = vadd.f32 %v1630_v63, %v3644_v45 }
 0x1a9   :  { %2305 = vst [vmem:[#allocation5 + $0xe0] sm:$0xff] %v2870_v60  ;;  %v2872_v3 = vpack.c.bf16 %v2937_v62, %v2936_v55  ;;  %2306 = vst [vmem:[#allocation5 + $0xe8] sm:$0xff] %v2871_v0  ;;  %v2873_v4 = vpack.c.bf16 %v2969_v1, %v2968_v61 }
 0x1ab   :  { %2307 = vst [vmem:[#allocation5 + $0xf0] sm:$0xff] %v2872_v3  ;;  %2308 = vst [vmem:[#allocation5 + $0xf8] sm:$0xff] %v2873_v4 }
 0x1ac   :  { %3235 = shalt.err (!%p3232_p12)
}
 0x1ad   :  { %s3236_s28 = scalar_lea.hbm %s3823_s3, 4096 }
 0x1ae   :  { %p3237_p13 = scmp.ne.s32.totalorder %s3823_s3, %s3236_s28  ;;  %p3240_p0 = scmp.lt.u32.totalorder %s3236_s28, %s3823_s3 }
 0x1b0   :  { %p3242_p1 = pnand %p3240_p0, %p3237_p13 }
 0x1b2   :  { %3245 = shalt.err (!%p3242_p1)
}
 0x1b3   :  { %s3279_s6 = smov 256   ;;  %s3280_s7 = smov 16   ;;  %v237_v42 = vsub.s32 4, %v3623_v27  ;;  %v245_v43 = vsub.s32 6, %v3623_v27  ;;  %v241_v44 = vsub.s32 5, %v3623_v27  ;;  %v249_v45 = vsub.s32 7, %v3623_v27 }
 0x1b4   :  { %2544 = dma.vmem_to_hbm [thread:$0]  %s2539_s24, 4096, %s3823_s3, [#allocation4], %s3279_s6, %s3279_s6, %s3280_s7  }
 0x1b5   :  { %v3730_v5 = vrot.slane %v3629_v38, %v237_v42  ;;  %v3733_v56 = vrot.slane %v3629_v38, %v245_v43  ;;  %v3736_v7 = vrot.slane %v3629_v38, %v241_v44  ;;  %v3739_v9 = vrot.slane %v3629_v38, %v249_v45  ;;  %s3281_s3 = smov [#allocation6]  }
 0x1b6   :  { %s2550_s10 = sshll.u32 %s3281_s3, 4  ;;  %s2551_s10 = int_to_ptr.vmem [resolvable:$true] %s2550_s10 }
 0x1b7   :  { %s3246_s11 = scalar_lea.vmem %s2551_s10, 4096  ;;  %p3251_p3 = scmp.lt.s32.totalorder %s2551_s10, %s2551_s10 }
 0x1b8   :  { %p3247_p2 = scmp.ne.s32.totalorder %s2551_s10, %s3246_s11  ;;  %p3252_p4 = scmp.lt.s32.totalorder %s3246_s11, %s3246_s11 }
 0x1ba   :  { %p3253_p5 = por %p3252_p4, %p3251_p3 }
 0x1bc   :  { %p3254_p6 = pnand %p3253_p5, %p3247_p2 }
 0x1eb   :  { %v1780_v10 = vpop.f32.mrb[32].mxu0  ;;  %v2006_v12 = vpop.f32.mrb[32].mxu1 }
 0x1ec   :  { %v2970_v11 = vadd.f32 %v1780_v10, %v3730_v5  ;;  %v1782_v8 = vpop.f32.mrb[33].mxu0  ;;  %v3002_v14 = vadd.f32 %v2006_v12, %v3733_v56  ;;  %v2008_v15 = vpop.f32.mrb[33].mxu1 }
 0x1ed   :  { %v2971_v27 = vadd.f32 %v1782_v8, %v3736_v7  ;;  %v1784_v31 = vpop.f32.mrb[34].mxu0  ;;  %v3003_v39 = vadd.f32 %v2008_v15, %v3739_v9  ;;  %v2010_v41 = vpop.f32.mrb[34].mxu1 }
 0x1ee   :  { %v2972_v40 = vadd.f32 %v1784_v31, %v3730_v5  ;;  %v1786_v46 = vpop.f32.mrb[35].mxu0  ;;  %v3004_v38 = vadd.f32 %v2010_v41, %v3733_v56  ;;  %v2012_v49 = vpop.f32.mrb[35].mxu1 }
 0x1ef   :  { %v2874_v47 = vpack.c.bf16 %v2971_v27, %v2970_v11  ;;  %v2973_v48 = vadd.f32 %v1786_v46, %v3736_v7  ;;  %v2875_v52 = vpack.c.bf16 %v3003_v39, %v3002_v14  ;;  %v3005_v6 = vadd.f32 %v2012_v49, %v3739_v9 }
 0x1f1   :  { %2501 = vst [vmem:[#allocation6] sm:$0xff] %v2874_v47  ;;  %v2876_v25 = vpack.c.bf16 %v2973_v48, %v2972_v40  ;;  %2502 = vst [vmem:[#allocation6 + $0x8] sm:$0xff] %v2875_v52  ;;  %v2877_v58 = vpack.c.bf16 %v3005_v6, %v3004_v38 }
 0x1f3   :  { %2503 = vst [vmem:[#allocation6 + $0x10] sm:$0xff] %v2876_v25  ;;  %v1790_v13 = vpop.f32.mrb[36].mxu0  ;;  %2504 = vst [vmem:[#allocation6 + $0x18] sm:$0xff] %v2877_v58  ;;  %v2016_v2 = vpop.f32.mrb[36].mxu1 }
 0x1f4   :  { %v2974_v34 = vadd.f32 %v1790_v13, %v3730_v5  ;;  %v1792_v16 = vpop.f32.mrb[37].mxu0  ;;  %v3006_v17 = vadd.f32 %v2016_v2, %v3733_v56  ;;  %v2018_v19 = vpop.f32.mrb[37].mxu1 }
 0x1f5   :  { %v2975_v18 = vadd.f32 %v1792_v16, %v3736_v7  ;;  %v1794_v20 = vpop.f32.mrb[38].mxu0  ;;  %v3007_v21 = vadd.f32 %v2018_v19, %v3739_v9  ;;  %v2020_v23 = vpop.f32.mrb[38].mxu1 }
 0x1f6   :  { %v2976_v22 = vadd.f32 %v1794_v20, %v3730_v5  ;;  %v1796_v24 = vpop.f32.mrb[39].mxu0  ;;  %v3008_v28 = vadd.f32 %v2020_v23, %v3733_v56  ;;  %v2022_v30 = vpop.f32.mrb[39].mxu1 }
 0x1f7   :  { %v2878_v26 = vpack.c.bf16 %v2975_v18, %v2974_v34  ;;  %v2977_v29 = vadd.f32 %v1796_v24, %v3736_v7  ;;  %v2879_v32 = vpack.c.bf16 %v3007_v21, %v3006_v17  ;;  %v3009_v33 = vadd.f32 %v2022_v30, %v3739_v9 }
 0x1f9   :  { %2505 = vst [vmem:[#allocation6 + $0x20] sm:$0xff] %v2878_v26  ;;  %v2880_v35 = vpack.c.bf16 %v2977_v29, %v2976_v22  ;;  %2506 = vst [vmem:[#allocation6 + $0x28] sm:$0xff] %v2879_v32  ;;  %v2881_v36 = vpack.c.bf16 %v3009_v33, %v3008_v28 }
 0x1fb   :  { %2507 = vst [vmem:[#allocation6 + $0x30] sm:$0xff] %v2880_v35  ;;  %v1800_v37 = vpop.f32.mrb[40].mxu0  ;;  %2508 = vst [vmem:[#allocation6 + $0x38] sm:$0xff] %v2881_v36  ;;  %v2026_v51 = vpop.f32.mrb[40].mxu1 }
 0x1fc   :  { %v2978_v50 = vadd.f32 %v1800_v37, %v3730_v5  ;;  %v1802_v53 = vpop.f32.mrb[41].mxu0  ;;  %v3010_v54 = vadd.f32 %v2026_v51, %v3733_v56  ;;  %v2028_v57 = vpop.f32.mrb[41].mxu1 }
 0x1fd   :  { %v2979_v55 = vadd.f32 %v1802_v53, %v3736_v7  ;;  %v1804_v59 = vpop.f32.mrb[42].mxu0  ;;  %v3011_v60 = vadd.f32 %v2028_v57, %v3739_v9  ;;  %v2030_v62 = vpop.f32.mrb[42].mxu1 }
 0x1fe   :  { %v2980_v61 = vadd.f32 %v1804_v59, %v3730_v5  ;;  %v1806_v63 = vpop.f32.mrb[43].mxu0  ;;  %v3012_v1 = vadd.f32 %v2030_v62, %v3733_v56  ;;  %v2032_v4 = vpop.f32.mrb[43].mxu1 }
 0x1ff   :  { %v2882_v0 = vpack.c.bf16 %v2979_v55, %v2978_v50  ;;  %v2981_v3 = vadd.f32 %v1806_v63, %v3736_v7  ;;  %v2883_v42 = vpack.c.bf16 %v3011_v60, %v3010_v54  ;;  %v3013_v43 = vadd.f32 %v2032_v4, %v3739_v9 }
 0x201   :  { %2509 = vst [vmem:[#allocation6 + $0x40] sm:$0xff] %v2882_v0  ;;  %v2884_v44 = vpack.c.bf16 %v2981_v3, %v2980_v61  ;;  %2510 = vst [vmem:[#allocation6 + $0x48] sm:$0xff] %v2883_v42  ;;  %v2885_v45 = vpack.c.bf16 %v3013_v43, %v3012_v1 }
 0x203   :  { %2511 = vst [vmem:[#allocation6 + $0x50] sm:$0xff] %v2884_v44  ;;  %v1810_v10 = vpop.f32.mrb[44].mxu0  ;;  %2512 = vst [vmem:[#allocation6 + $0x58] sm:$0xff] %v2885_v45  ;;  %v2036_v12 = vpop.f32.mrb[44].mxu1 }
 0x204   :  { %v2982_v11 = vadd.f32 %v1810_v10, %v3730_v5  ;;  %v1812_v8 = vpop.f32.mrb[45].mxu0  ;;  %v3014_v14 = vadd.f32 %v2036_v12, %v3733_v56  ;;  %v2038_v15 = vpop.f32.mrb[45].mxu1 }
 0x205   :  { %v2983_v27 = vadd.f32 %v1812_v8, %v3736_v7  ;;  %v1814_v31 = vpop.f32.mrb[46].mxu0  ;;  %v3015_v39 = vadd.f32 %v2038_v15, %v3739_v9  ;;  %v2040_v41 = vpop.f32.mrb[46].mxu1 }
 0x206   :  { %v2984_v40 = vadd.f32 %v1814_v31, %v3730_v5  ;;  %v1816_v46 = vpop.f32.mrb[47].mxu0  ;;  %v3016_v38 = vadd.f32 %v2040_v41, %v3733_v56  ;;  %v2042_v49 = vpop.f32.mrb[47].mxu1 }
 0x207   :  { %v2886_v47 = vpack.c.bf16 %v2983_v27, %v2982_v11  ;;  %v2985_v48 = vadd.f32 %v1816_v46, %v3736_v7  ;;  %v2887_v52 = vpack.c.bf16 %v3015_v39, %v3014_v14  ;;  %v3017_v6 = vadd.f32 %v2042_v49, %v3739_v9 }
 0x209   :  { %2513 = vst [vmem:[#allocation6 + $0x60] sm:$0xff] %v2886_v47  ;;  %v2888_v25 = vpack.c.bf16 %v2985_v48, %v2984_v40  ;;  %2514 = vst [vmem:[#allocation6 + $0x68] sm:$0xff] %v2887_v52  ;;  %v2889_v58 = vpack.c.bf16 %v3017_v6, %v3016_v38 }
 0x20b   :  { %2515 = vst [vmem:[#allocation6 + $0x70] sm:$0xff] %v2888_v25  ;;  %v1820_v13 = vpop.f32.mrb[48].mxu0  ;;  %2516 = vst [vmem:[#allocation6 + $0x78] sm:$0xff] %v2889_v58  ;;  %v2046_v2 = vpop.f32.mrb[48].mxu1 }
 0x20c   :  { %v2986_v34 = vadd.f32 %v1820_v13, %v3730_v5  ;;  %v1822_v16 = vpop.f32.mrb[49].mxu0  ;;  %v3018_v17 = vadd.f32 %v2046_v2, %v3733_v56  ;;  %v2048_v19 = vpop.f32.mrb[49].mxu1 }
 0x20d   :  { %v2987_v18 = vadd.f32 %v1822_v16, %v3736_v7  ;;  %v1824_v20 = vpop.f32.mrb[50].mxu0  ;;  %v3019_v21 = vadd.f32 %v2048_v19, %v3739_v9  ;;  %v2050_v23 = vpop.f32.mrb[50].mxu1 }
 0x20e   :  { %v2988_v22 = vadd.f32 %v1824_v20, %v3730_v5  ;;  %v1826_v24 = vpop.f32.mrb[51].mxu0  ;;  %v3020_v28 = vadd.f32 %v2050_v23, %v3733_v56  ;;  %v2052_v30 = vpop.f32.mrb[51].mxu1 }
 0x20f   :  { %v2890_v26 = vpack.c.bf16 %v2987_v18, %v2986_v34  ;;  %v2989_v29 = vadd.f32 %v1826_v24, %v3736_v7  ;;  %v2891_v32 = vpack.c.bf16 %v3019_v21, %v3018_v17  ;;  %v3021_v33 = vadd.f32 %v2052_v30, %v3739_v9 }
 0x211   :  { %2517 = vst [vmem:[#allocation6 + $0x80] sm:$0xff] %v2890_v26  ;;  %v2892_v35 = vpack.c.bf16 %v2989_v29, %v2988_v22  ;;  %2518 = vst [vmem:[#allocation6 + $0x88] sm:$0xff] %v2891_v32  ;;  %v2893_v36 = vpack.c.bf16 %v3021_v33, %v3020_v28 }
 0x213   :  { %2519 = vst [vmem:[#allocation6 + $0x90] sm:$0xff] %v2892_v35  ;;  %v1830_v37 = vpop.f32.mrb[52].mxu0  ;;  %2520 = vst [vmem:[#allocation6 + $0x98] sm:$0xff] %v2893_v36  ;;  %v2056_v51 = vpop.f32.mrb[52].mxu1 }
 0x214   :  { %v2990_v50 = vadd.f32 %v1830_v37, %v3730_v5  ;;  %v1832_v53 = vpop.f32.mrb[53].mxu0  ;;  %v3022_v54 = vadd.f32 %v2056_v51, %v3733_v56  ;;  %v2058_v57 = vpop.f32.mrb[53].mxu1 }
 0x215   :  { %v2991_v55 = vadd.f32 %v1832_v53, %v3736_v7  ;;  %v1834_v59 = vpop.f32.mrb[54].mxu0  ;;  %v3023_v60 = vadd.f32 %v2058_v57, %v3739_v9  ;;  %v2060_v62 = vpop.f32.mrb[54].mxu1 }
 0x216   :  { %v2992_v61 = vadd.f32 %v1834_v59, %v3730_v5  ;;  %v1836_v63 = vpop.f32.mrb[55].mxu0  ;;  %v3024_v1 = vadd.f32 %v2060_v62, %v3733_v56  ;;  %v2062_v4 = vpop.f32.mrb[55].mxu1 }
 0x217   :  { %v2894_v0 = vpack.c.bf16 %v2991_v55, %v2990_v50  ;;  %v2993_v3 = vadd.f32 %v1836_v63, %v3736_v7  ;;  %v2895_v42 = vpack.c.bf16 %v3023_v60, %v3022_v54  ;;  %v3025_v43 = vadd.f32 %v2062_v4, %v3739_v9 }
 0x219   :  { %2521 = vst [vmem:[#allocation6 + $0xa0] sm:$0xff] %v2894_v0  ;;  %v2896_v44 = vpack.c.bf16 %v2993_v3, %v2992_v61  ;;  %2522 = vst [vmem:[#allocation6 + $0xa8] sm:$0xff] %v2895_v42  ;;  %v2897_v45 = vpack.c.bf16 %v3025_v43, %v3024_v1 }
 0x21b   :  { %2523 = vst [vmem:[#allocation6 + $0xb0] sm:$0xff] %v2896_v44  ;;  %v1840_v10 = vpop.f32.mrb[56].mxu0  ;;  %2524 = vst [vmem:[#allocation6 + $0xb8] sm:$0xff] %v2897_v45  ;;  %v2066_v12 = vpop.f32.mrb[56].mxu1 }
 0x21c   :  { %v2994_v11 = vadd.f32 %v1840_v10, %v3730_v5  ;;  %v1842_v8 = vpop.f32.mrb[57].mxu0  ;;  %v3026_v14 = vadd.f32 %v2066_v12, %v3733_v56  ;;  %v2068_v15 = vpop.f32.mrb[57].mxu1 }
 0x21d   :  { %v2995_v27 = vadd.f32 %v1842_v8, %v3736_v7  ;;  %v1844_v31 = vpop.f32.mrb[58].mxu0  ;;  %v3027_v39 = vadd.f32 %v2068_v15, %v3739_v9  ;;  %v2070_v41 = vpop.f32.mrb[58].mxu1 }
 0x21e   :  { %v2996_v40 = vadd.f32 %v1844_v31, %v3730_v5  ;;  %v1846_v46 = vpop.f32.mrb[59].mxu0  ;;  %v3028_v38 = vadd.f32 %v2070_v41, %v3733_v56  ;;  %v2072_v49 = vpop.f32.mrb[59].mxu1 }
 0x21f   :  { %v2898_v47 = vpack.c.bf16 %v2995_v27, %v2994_v11  ;;  %v2997_v48 = vadd.f32 %v1846_v46, %v3736_v7  ;;  %v2899_v52 = vpack.c.bf16 %v3027_v39, %v3026_v14  ;;  %v3029_v6 = vadd.f32 %v2072_v49, %v3739_v9 }
 0x221   :  { %2525 = vst [vmem:[#allocation6 + $0xc0] sm:$0xff] %v2898_v47  ;;  %v2900_v25 = vpack.c.bf16 %v2997_v48, %v2996_v40  ;;  %2526 = vst [vmem:[#allocation6 + $0xc8] sm:$0xff] %v2899_v52  ;;  %v2901_v58 = vpack.c.bf16 %v3029_v6, %v3028_v38 }
 0x223   :  { %2527 = vst [vmem:[#allocation6 + $0xd0] sm:$0xff] %v2900_v25  ;;  %v1850_v13 = vpop.f32.mrb[60].mxu0  ;;  %2528 = vst [vmem:[#allocation6 + $0xd8] sm:$0xff] %v2901_v58  ;;  %v2076_v2 = vpop.f32.mrb[60].mxu1 }
 0x224   :  { %v2998_v34 = vadd.f32 %v1850_v13, %v3730_v5  ;;  %v1852_v16 = vpop.f32.mrb[61].mxu0  ;;  %v3030_v17 = vadd.f32 %v2076_v2, %v3733_v56  ;;  %v2078_v19 = vpop.f32.mrb[61].mxu1 }
 0x225   :  { %v2999_v18 = vadd.f32 %v1852_v16, %v3736_v7  ;;  %v1854_v20 = vpop.f32.mrb[62].mxu0  ;;  %v3031_v21 = vadd.f32 %v2078_v19, %v3739_v9  ;;  %v2080_v23 = vpop.f32.mrb[62].mxu1 }
 0x226   :  { %v3000_v22 = vadd.f32 %v1854_v20, %v3730_v5  ;;  %v1856_v24 = vpop.f32.mrb[63].mxu0  ;;  %v3032_v28 = vadd.f32 %v2080_v23, %v3733_v56  ;;  %v2082_v30 = vpop.f32.mrb[63].mxu1 }
 0x227   :  { %v2902_v26 = vpack.c.bf16 %v2999_v18, %v2998_v34  ;;  %v3001_v29 = vadd.f32 %v1856_v24, %v3736_v7  ;;  %v2903_v32 = vpack.c.bf16 %v3031_v21, %v3030_v17  ;;  %v3033_v33 = vadd.f32 %v2082_v30, %v3739_v9 }
 0x229   :  { %2529 = vst [vmem:[#allocation6 + $0xe0] sm:$0xff] %v2902_v26  ;;  %v2904_v35 = vpack.c.bf16 %v3001_v29, %v3000_v22  ;;  %2530 = vst [vmem:[#allocation6 + $0xe8] sm:$0xff] %v2903_v32  ;;  %v2905_v36 = vpack.c.bf16 %v3033_v33, %v3032_v28 }
 0x22b   :  { %2531 = vst [vmem:[#allocation6 + $0xf0] sm:$0xff] %v2904_v35  ;;  %2532 = vst [vmem:[#allocation6 + $0xf8] sm:$0xff] %v2905_v36 }
 0x22c   :  { %3257 = shalt.err (!%p3254_p6)
}
 0x22d   :  { %s3258_s14 = scalar_lea.hbm %s3824_s4, 4096 }
 0x22e   :  { %p3259_p7 = scmp.ne.s32.totalorder %s3824_s4, %s3258_s14  ;;  %p3262_p8 = scmp.lt.u32.totalorder %s3258_s14, %s3824_s4 }
 0x230   :  { %p3264_p9 = pnand %p3262_p8, %p3259_p7 }
 0x232   :  { %3267 = shalt.err (!%p3264_p9)
}
 0x233   :  { %2556 = dma.vmem_to_hbm [thread:$0]  %s2551_s10, 4096, %s3824_s4, [#allocation7], %s3279_s6, %s3279_s6, %s3280_s7  }
 0x234   :  { %3270 = dma.done.wait [#allocation4], 4096  }
 0x235   :  { %3271 = vsyncadd [#allocation4], 4294963200 }
 0x236   :  { %3272 = dma.done.wait [#allocation7], 4096  }
 0x237   :  { %3273 = vsyncadd [#allocation7], 4294963200 }
 0x238   :  { %2563 = vsyncpa [#allocation3], 1 }
 0x239   :  { %2564 = vsyncpa [#allocation4], 1 }
 0x23a   :  { %2565 = vsyncpa [#allocation7], 1 }

</bundles_post_ra>
